<compile_context>
chip_gen: v6e
topology: v6e:2x2x1
jax: 0.10.0
libtpu: 0.0.40
codegen_flags: <defaults>
</compile_context>

<pallas_src>
import functools

import jax
import jax.numpy as jnp
import numpy as np
from jax.experimental import pallas as pl
from jax.experimental.pallas import tpu as pltpu

# --- small config consistent with the module ---------------------------------
IN_FEATS = 16
HID_FEATS = 32
OUT_FEATS = 8
NUM_HEADS = 4
D1 = HID_FEATS // NUM_HEADS   # per-head width of conv1
D2 = HID_FEATS                # per-head width of conv2
NEG_SLOPE = 0.2
N_NODES = 8


def _gatv2_layer(x, bias3, w_src, b_src, w_dst, b_dst, ablk, sel, segsum):
    """Dense-adjacency GATv2Conv, all heads batched on the MXU.

    Returns the per-head outputs head-major flattened: (N, H*D).
      ablk   : (H*D, H)  block-diagonal attention vectors
      sel    : (H, H*D)  head-selector (broadcast head weight across its D lanes)
      segsum : (N, N*N)  segment-sum matrix, segsum[d, d*N + s] = 1
      bias3  : (N, N, 1) additive softmax mask (0 on edges, -1e30 elsewhere)
    """
    n = x.shape[0]
    hd = w_src.shape[1]
    nh = ablk.shape[1]

    fs = jnp.dot(x, w_src, preferred_element_type=jnp.float32) + b_src     # (Ns, HD)
    fd = jnp.dot(x, w_dst, preferred_element_type=jnp.float32) + b_dst     # (Nd, HD)

    # pairwise pre-activation over the full H*D lane width, leaky_relu once
    m = fd[:, None, :] + fs[None, :, :]                                    # (Nd, Ns, HD)
    m = jnp.where(m >= 0.0, m, NEG_SLOPE * m)

    # attention logits for ALL heads with one MXU matmul (block-diag attn)
    e = jnp.dot(m.reshape(n * n, hd), ablk,
                preferred_element_type=jnp.float32).reshape(n, n, nh)      # (Nd, Ns, H)

    # masked softmax over incoming edges (axis=1 == source nodes), all heads at once
    logits = e + bias3                                                     # (Nd, Ns, H)
    mx = jnp.max(logits, axis=1, keepdims=True)                            # (Nd, 1, H)
    p = jnp.exp(logits - mx)                                               # (Nd, Ns, H)
    inv = pl.reciprocal(jnp.sum(p, axis=1), approx=True)                   # (Nd, H)

    # broadcast each head's (unnormalized) weight across that head's feature lanes
    p_wide = jnp.dot(p.reshape(n * n, nh), sel,
                     preferred_element_type=jnp.float32).reshape(n, n, hd)  # (Nd, Ns, HD)

    # weight source features and contract over sources with a segment-sum matmul
    weighted = (p_wide * fs[None, :, :]).reshape(n * n, hd)                # (Nd*Ns, HD)
    out = jnp.dot(segsum, weighted, preferred_element_type=jnp.float32)    # (Nd, HD)

    # apply the softmax normalization once per destination (broadcast via MXU)
    inv_wide = jnp.dot(inv, sel, preferred_element_type=jnp.float32)       # (Nd, HD)
    return out * inv_wide                                                  # (Nd, H*D) head-major


def gat_kernel(x_ref, adj_ref,
               w1s_ref, b1s_ref, w1d_ref, b1d_ref, a1_ref, sel1_ref,
               w2s_ref, b2s_ref, w2d_ref, b2d_ref, a2_ref, sel2_ref,
               seg_ref, wp_ref, bp_ref,
               out_ref):
    x = x_ref[...]
    # additive softmax mask, computed once and shared by both layers
    bias3 = ((adj_ref[...] - 1.0) * jnp.float32(1e30))[:, :, None]         # (Nd, Ns, 1)
    segsum = seg_ref[...]

    # ---- conv1 -> relu (already head-major flattened, no scratch round-trip) ----
    h1 = _gatv2_layer(x, bias3, w1s_ref[...], b1s_ref[...],
                      w1d_ref[...], b1d_ref[...],
                      a1_ref[...], sel1_ref[...], segsum)                  # (N, HID)
    h1 = jnp.maximum(h1, 0.0)

    # ---- conv2 -> relu per head ----
    h2 = _gatv2_layer(h1, bias3, w2s_ref[...], b2s_ref[...],
                      w2d_ref[...], b2d_ref[...],
                      a2_ref[...], sel2_ref[...], segsum)                  # (N, H*HID)
    h2 = jnp.maximum(h2, 0.0)

    # head-sum + (no-op) relu + projection fused into a single matmul with the
    # head-tiled projection weight.
    out_ref[...] = (jnp.dot(h2, wp_ref[...], preferred_element_type=jnp.float32)
                    + bp_ref[...])


def _block_diag_attn(attn):
    """(H, D) attention vectors -> (H*D, H) block-diagonal matrix."""
    h, d = attn.shape
    eye = jnp.eye(h, dtype=jnp.float32)
    return (attn[:, :, None] * eye[:, None, :]).reshape(h * d, h)


def gat_forward(x, adj, params):
    n = x.shape[0]
    h = NUM_HEADS
    # constant / parameter restructuring (endorsed: block-diag attn, stacked proj)
    ablk1 = _block_diag_attn(params["attn1"])                              # (H*D1, H)
    ablk2 = _block_diag_attn(params["attn2"])                              # (H*D2, H)
    sel1 = jnp.repeat(jnp.eye(h, dtype=jnp.float32), D1, axis=1)           # (H, H*D1)
    sel2 = jnp.repeat(jnp.eye(h, dtype=jnp.float32), D2, axis=1)           # (H, H*D2)
    seg = jnp.asarray(np.kron(np.eye(n, dtype=np.float32),
                              np.ones((1, n), dtype=np.float32)))          # (N, N*N)
    wpt = jnp.tile(params["w_proj"], (h, 1))                               # (H*D2, OUT)

    args = (x, adj,
            params["w1_src"], params["b1_src"], params["w1_dst"], params["b1_dst"],
            ablk1, sel1,
            params["w2_src"], params["b2_src"], params["w2_dst"], params["b2_dst"],
            ablk2, sel2,
            seg, wpt, params["b_proj"])
    in_specs = [pl.BlockSpec(a.shape, functools.partial(lambda nd, i: (0,) * nd, a.ndim))
                for a in args]
    # TODO(synk): at N=8 the call is fixed-overhead bound and the (N, OUT) store is a
    # masked corner of one vreg; a batched-graphs grid ("parallel" for v7x megacore)
    # and lane-dense output packing would be the next step if N / batch grows.
    return pl.pallas_call(
        gat_kernel,
        out_shape=jax.ShapeDtypeStruct((n, OUT_FEATS), jnp.float32),
        grid=(1,),
        in_specs=in_specs,
        out_specs=pl.BlockSpec((n, OUT_FEATS), lambda i: (0, 0)),
        compiler_params=pltpu.CompilerParams(dimension_semantics=("arbitrary",)),
    )(*args)


# ---- pure-JAX reference (mirrors torch/DGL math) for a correctness check ----
def gat_reference(x, adj, params):
    def conv(xin, ws, bs, wd, bd, attn, d):
        n = xin.shape[0]
        fs = (xin @ ws + bs).reshape(n, NUM_HEADS, d)
        fd = (xin @ wd + bd).reshape(n, NUM_HEADS, d)
        m = fd[:, None] + fs[None, :]                        # (Nd, Ns, H, d)
        m = jnp.where(m >= 0, m, NEG_SLOPE * m)
        e = (m * attn.reshape(1, 1, NUM_HEADS, d)).sum(-1)   # (Nd, Ns, H)
        mask = (adj > 0)[:, :, None]
        logits = jnp.where(mask, e, -jnp.inf)
        alpha = jax.nn.softmax(logits, axis=1)
        alpha = jnp.where(mask, alpha, 0.0)
        return jnp.einsum("dsh,shk->dhk", alpha, fs)         # (Nd, H, d)

    h = conv(x, params["w1_src"], params["b1_src"], params["w1_dst"],
             params["b1_dst"], params["attn1"], D1)
    h = jax.nn.relu(h).reshape(-1, HID_FEATS)
    h = conv(h, params["w2_src"], params["b2_src"], params["w2_dst"],
             params["b2_dst"], params["attn2"], D2)
    h = jax.nn.relu(h).sum(axis=1)
    return jax.nn.relu(h) @ params["w_proj"] + params["b_proj"]


if __name__ == "__main__":
    key = jax.random.PRNGKey(0)
    ks = jax.random.split(key, 16)

    def rnd(k, shape, scale=0.1):
        return scale * jax.random.normal(k, shape, jnp.float32)

    params = {
        "w1_src": rnd(ks[0], (IN_FEATS, NUM_HEADS * D1)),
        "b1_src": rnd(ks[1], (1, NUM_HEADS * D1)),
        "w1_dst": rnd(ks[2], (IN_FEATS, NUM_HEADS * D1)),
        "b1_dst": rnd(ks[3], (1, NUM_HEADS * D1)),
        "attn1":  rnd(ks[4], (NUM_HEADS, D1)),
        "w2_src": rnd(ks[5], (HID_FEATS, NUM_HEADS * D2)),
        "b2_src": rnd(ks[6], (1, NUM_HEADS * D2)),
        "w2_dst": rnd(ks[7], (HID_FEATS, NUM_HEADS * D2)),
        "b2_dst": rnd(ks[8], (1, NUM_HEADS * D2)),
        "attn2":  rnd(ks[9], (NUM_HEADS, D2)),
        "w_proj": rnd(ks[10], (HID_FEATS, OUT_FEATS)),
        "b_proj": rnd(ks[11], (1, OUT_FEATS)),
    }

    # node features
    x = jax.random.normal(ks[12], (N_NODES, IN_FEATS), jnp.float32)

    # small directed graph: ring (s -> s+1) plus self-loops (no zero in-degree,
    # matching allow_zero_in_degree=False). adj[d, s] = 1 iff edge s -> d.
    adj_np = np.eye(N_NODES, dtype=np.float32)
    for s in range(N_NODES):
        adj_np[(s + 1) % N_NODES, s] = 1.0
    adj = jnp.asarray(adj_np)

    out = jax.jit(gat_forward)(x, adj, params)
    out = jax.block_until_ready(out)

    ref = gat_reference(x, adj, params)
    np.testing.assert_allclose(np.asarray(out), np.asarray(ref), rtol=1e-2, atol=1e-3)

    # TODO(synk): feat_drop / attn_drop are 0.0 in this module, so dropout is omitted.
    print("KERNEL_OK")
</pallas_src>

<mosaic_0001>
module attributes {stable_mosaic.version = 11 : i64} {
  func.func @gat_kernel(%arg0: i32, %arg1: memref<8x16xf32, #tpu.memory_space<vmem>>, %arg2: memref<8x8xf32, #tpu.memory_space<vmem>>, %arg3: memref<16x32xf32, #tpu.memory_space<vmem>>, %arg4: memref<1x32xf32, #tpu.memory_space<vmem>>, %arg5: memref<16x32xf32, #tpu.memory_space<vmem>>, %arg6: memref<1x32xf32, #tpu.memory_space<vmem>>, %arg7: memref<32x4xf32, #tpu.memory_space<vmem>>, %arg8: memref<4x32xf32, #tpu.memory_space<vmem>>, %arg9: memref<32x128xf32, #tpu.memory_space<vmem>>, %arg10: memref<1x128xf32, #tpu.memory_space<vmem>>, %arg11: memref<32x128xf32, #tpu.memory_space<vmem>>, %arg12: memref<1x128xf32, #tpu.memory_space<vmem>>, %arg13: memref<128x4xf32, #tpu.memory_space<vmem>>, %arg14: memref<4x128xf32, #tpu.memory_space<vmem>>, %arg15: memref<8x64xf32, #tpu.memory_space<vmem>>, %arg16: memref<128x8xf32, #tpu.memory_space<vmem>>, %arg17: memref<1x8xf32, #tpu.memory_space<vmem>>, %arg18: memref<8x8xf32, #tpu.memory_space<vmem>>) attributes {dimension_semantics = [#tpu.dimension_semantics<arbitrary>], iteration_bounds = array<i64: 1>, scalar_prefetch = 0 : i64, scratch_operands = 0 : i64, tpu.core_type = #tpu.core_type<tc>, window_params = [{pipeline_mode = #tpu.pipeline_mode<synchronous>, transform_indices = @transform_0, window_bounds = array<i64: 8, 16>}, {pipeline_mode = #tpu.pipeline_mode<synchronous>, transform_indices = @transform_1, window_bounds = array<i64: 8, 8>}, {pipeline_mode = #tpu.pipeline_mode<synchronous>, transform_indices = @transform_2, window_bounds = array<i64: 16, 32>}, {pipeline_mode = #tpu.pipeline_mode<synchronous>, transform_indices = @transform_3, window_bounds = array<i64: 1, 32>}, {pipeline_mode = #tpu.pipeline_mode<synchronous>, transform_indices = @transform_4, window_bounds = array<i64: 16, 32>}, {pipeline_mode = #tpu.pipeline_mode<synchronous>, transform_indices = @transform_5, window_bounds = array<i64: 1, 32>}, {pipeline_mode = #tpu.pipeline_mode<synchronous>, transform_indices = @transform_6, window_bounds = array<i64: 32, 4>}, {pipeline_mode = #tpu.pipeline_mode<synchronous>, transform_indices = @transform_7, window_bounds = array<i64: 4, 32>}, {pipeline_mode = #tpu.pipeline_mode<synchronous>, transform_indices = @transform_8, window_bounds = array<i64: 32, 128>}, {pipeline_mode = #tpu.pipeline_mode<synchronous>, transform_indices = @transform_9, window_bounds = array<i64: 1, 128>}, {pipeline_mode = #tpu.pipeline_mode<synchronous>, transform_indices = @transform_10, window_bounds = array<i64: 32, 128>}, {pipeline_mode = #tpu.pipeline_mode<synchronous>, transform_indices = @transform_11, window_bounds = array<i64: 1, 128>}, {pipeline_mode = #tpu.pipeline_mode<synchronous>, transform_indices = @transform_12, window_bounds = array<i64: 128, 4>}, {pipeline_mode = #tpu.pipeline_mode<synchronous>, transform_indices = @transform_13, window_bounds = array<i64: 4, 128>}, {pipeline_mode = #tpu.pipeline_mode<synchronous>, transform_indices = @transform_14, window_bounds = array<i64: 8, 64>}, {pipeline_mode = #tpu.pipeline_mode<synchronous>, transform_indices = @transform_15, window_bounds = array<i64: 128, 8>}, {pipeline_mode = #tpu.pipeline_mode<synchronous>, transform_indices = @transform_16, window_bounds = array<i64: 1, 8>}, {pipeline_mode = #tpu.pipeline_mode<synchronous>, transform_indices = @transform_17, window_bounds = array<i64: 8, 8>}]} {
    %c0 = arith.constant 0 : index
    %c0_0 = arith.constant 0 : index
    %0 = vector.load %arg1[%c0, %c0_0] : memref<8x16xf32, #tpu.memory_space<vmem>>, vector<8x16xf32>
    %c0_1 = arith.constant 0 : index
    %c0_2 = arith.constant 0 : index
    %1 = vector.load %arg2[%c0_1, %c0_2] : memref<8x8xf32, #tpu.memory_space<vmem>>, vector<8x8xf32>
    %cst = arith.constant 1.000000e+00 : f32
    %2 = vector.broadcast %cst : f32 to vector<8x8xf32>
    %3 = arith.subf %1, %2 : vector<8x8xf32>
    %cst_3 = arith.constant 1.000000e+30 : f32
    %4 = vector.broadcast %cst_3 : f32 to vector<8x8xf32>
    %5 = arith.mulf %3, %4 : vector<8x8xf32>
    %6 = vector.shape_cast %5 : vector<8x8xf32> to vector<8x8x1xf32>
    %c0_4 = arith.constant 0 : index
    %c0_5 = arith.constant 0 : index
    %7 = vector.load %arg15[%c0_4, %c0_5] : memref<8x64xf32, #tpu.memory_space<vmem>>, vector<8x64xf32>
    %c0_6 = arith.constant 0 : index
    %c0_7 = arith.constant 0 : index
    %8 = vector.load %arg3[%c0_6, %c0_7] : memref<16x32xf32, #tpu.memory_space<vmem>>, vector<16x32xf32>
    %c0_8 = arith.constant 0 : index
    %c0_9 = arith.constant 0 : index
    %9 = vector.load %arg4[%c0_8, %c0_9] : memref<1x32xf32, #tpu.memory_space<vmem>>, vector<1x32xf32>
    %c0_10 = arith.constant 0 : index
    %c0_11 = arith.constant 0 : index
    %10 = vector.load %arg5[%c0_10, %c0_11] : memref<16x32xf32, #tpu.memory_space<vmem>>, vector<16x32xf32>
    %c0_12 = arith.constant 0 : index
    %c0_13 = arith.constant 0 : index
    %11 = vector.load %arg6[%c0_12, %c0_13] : memref<1x32xf32, #tpu.memory_space<vmem>>, vector<1x32xf32>
    %c0_14 = arith.constant 0 : index
    %c0_15 = arith.constant 0 : index
    %12 = vector.load %arg7[%c0_14, %c0_15] : memref<32x4xf32, #tpu.memory_space<vmem>>, vector<32x4xf32>
    %c0_16 = arith.constant 0 : index
    %c0_17 = arith.constant 0 : index
    %13 = vector.load %arg8[%c0_16, %c0_17] : memref<4x32xf32, #tpu.memory_space<vmem>>, vector<4x32xf32>
    %cst_18 = arith.constant dense<0.000000e+00> : vector<8x32xf32>
    %14 = tpu.matmul %0, %8, %cst_18 {dimension_numbers = #tpu.dot_dimension_numbers<[1], [0], [0], [1], [0, 0, 1, 1], [], []>} : vector<8x16xf32>, vector<16x32xf32>, vector<8x32xf32> -> vector<8x32xf32>
    %15 = vector.broadcast %9 : vector<1x32xf32> to vector<8x32xf32>
    %16 = arith.addf %14, %15 : vector<8x32xf32>
    %cst_19 = arith.constant dense<0.000000e+00> : vector<8x32xf32>
    %17 = tpu.matmul %0, %10, %cst_19 {dimension_numbers = #tpu.dot_dimension_numbers<[1], [0], [0], [1], [0, 0, 1, 1], [], []>} : vector<8x16xf32>, vector<16x32xf32>, vector<8x32xf32> -> vector<8x32xf32>
    %18 = vector.broadcast %11 : vector<1x32xf32> to vector<8x32xf32>
    %19 = arith.addf %17, %18 : vector<8x32xf32>
    %20 = vector.shape_cast %19 : vector<8x32xf32> to vector<8x1x32xf32>
    %21 = vector.shape_cast %16 : vector<8x32xf32> to vector<1x8x32xf32>
    %22 = vector.broadcast %20 : vector<8x1x32xf32> to vector<8x8x32xf32>
    %23 = vector.broadcast %21 : vector<1x8x32xf32> to vector<8x8x32xf32>
    %24 = arith.addf %22, %23 : vector<8x8x32xf32>
    %cst_20 = arith.constant 0.000000e+00 : f32
    %25 = vector.broadcast %cst_20 : f32 to vector<8x8x32xf32>
    %26 = arith.cmpf oge, %24, %25 : vector<8x8x32xf32>
    %cst_21 = arith.constant 2.000000e-01 : f32
    %27 = vector.broadcast %cst_21 : f32 to vector<8x8x32xf32>
    %28 = arith.mulf %27, %24 : vector<8x8x32xf32>
    %29 = arith.select %26, %24, %28 : vector<8x8x32xi1>, vector<8x8x32xf32>
    %30 = vector.shape_cast %29 : vector<8x8x32xf32> to vector<64x32xf32>
    %cst_22 = arith.constant dense<0.000000e+00> : vector<64x4xf32>
    %31 = tpu.matmul %30, %12, %cst_22 {dimension_numbers = #tpu.dot_dimension_numbers<[1], [0], [0], [1], [0, 0, 1, 1], [], []>} : vector<64x32xf32>, vector<32x4xf32>, vector<64x4xf32> -> vector<64x4xf32>
    %32 = vector.shape_cast %31 : vector<64x4xf32> to vector<8x8x4xf32>
    %33 = vector.broadcast %6 : vector<8x8x1xf32> to vector<8x8x4xf32>
    %34 = arith.addf %32, %33 : vector<8x8x4xf32>
    %cst_23 = arith.constant dense<0xFF800000> : vector<8x4xf32>
    %35 = vector.multi_reduction <maximumf>, %34, %cst_23 [1] : vector<8x8x4xf32> to vector<8x4xf32>
    %36 = vector.shape_cast %35 : vector<8x4xf32> to vector<8x1x4xf32>
    %37 = vector.broadcast %36 : vector<8x1x4xf32> to vector<8x8x4xf32>
    %38 = arith.subf %34, %37 : vector<8x8x4xf32>
    %39 = math.exp %38 : vector<8x8x4xf32>
    %cst_24 = arith.constant dense<0.000000e+00> : vector<8x4xf32>
    %40 = vector.multi_reduction <add>, %39, %cst_24 [1] : vector<8x8x4xf32> to vector<8x4xf32>
    %41 = tpu.reciprocal %40 {approx = true} : vector<8x4xf32> -> vector<8x4xf32>
    %42 = vector.shape_cast %39 : vector<8x8x4xf32> to vector<64x4xf32>
    %cst_25 = arith.constant dense<0.000000e+00> : vector<64x32xf32>
    %43 = tpu.matmul %42, %13, %cst_25 {dimension_numbers = #tpu.dot_dimension_numbers<[1], [0], [0], [1], [0, 0, 1, 1], [], []>} : vector<64x4xf32>, vector<4x32xf32>, vector<64x32xf32> -> vector<64x32xf32>
    %44 = vector.shape_cast %43 : vector<64x32xf32> to vector<8x8x32xf32>
    %45 = vector.shape_cast %16 : vector<8x32xf32> to vector<1x8x32xf32>
    %46 = vector.broadcast %45 : vector<1x8x32xf32> to vector<8x8x32xf32>
    %47 = arith.mulf %44, %46 : vector<8x8x32xf32>
    %48 = vector.shape_cast %47 : vector<8x8x32xf32> to vector<64x32xf32>
    %cst_26 = arith.constant dense<0.000000e+00> : vector<8x32xf32>
    %49 = tpu.matmul %7, %48, %cst_26 {dimension_numbers = #tpu.dot_dimension_numbers<[1], [0], [0], [1], [0, 0, 1, 1], [], []>} : vector<8x64xf32>, vector<64x32xf32>, vector<8x32xf32> -> vector<8x32xf32>
    %cst_27 = arith.constant dense<0.000000e+00> : vector<8x32xf32>
    %50 = tpu.matmul %41, %13, %cst_27 {dimension_numbers = #tpu.dot_dimension_numbers<[1], [0], [0], [1], [0, 0, 1, 1], [], []>} : vector<8x4xf32>, vector<4x32xf32>, vector<8x32xf32> -> vector<8x32xf32>
    %51 = arith.mulf %49, %50 : vector<8x32xf32>
    %cst_28 = arith.constant 0.000000e+00 : f32
    %52 = vector.broadcast %cst_28 : f32 to vector<8x32xf32>
    %53 = arith.maximumf %51, %52 : vector<8x32xf32>
    %c0_29 = arith.constant 0 : index
    %c0_30 = arith.constant 0 : index
    %54 = vector.load %arg9[%c0_29, %c0_30] : memref<32x128xf32, #tpu.memory_space<vmem>>, vector<32x128xf32>
    %c0_31 = arith.constant 0 : index
    %c0_32 = arith.constant 0 : index
    %55 = vector.load %arg10[%c0_31, %c0_32] : memref<1x128xf32, #tpu.memory_space<vmem>>, vector<1x128xf32>
    %c0_33 = arith.constant 0 : index
    %c0_34 = arith.constant 0 : index
    %56 = vector.load %arg11[%c0_33, %c0_34] : memref<32x128xf32, #tpu.memory_space<vmem>>, vector<32x128xf32>
    %c0_35 = arith.constant 0 : index
    %c0_36 = arith.constant 0 : index
    %57 = vector.load %arg12[%c0_35, %c0_36] : memref<1x128xf32, #tpu.memory_space<vmem>>, vector<1x128xf32>
    %c0_37 = arith.constant 0 : index
    %c0_38 = arith.constant 0 : index
    %58 = vector.load %arg13[%c0_37, %c0_38] : memref<128x4xf32, #tpu.memory_space<vmem>>, vector<128x4xf32>
    %c0_39 = arith.constant 0 : index
    %c0_40 = arith.constant 0 : index
    %59 = vector.load %arg14[%c0_39, %c0_40] : memref<4x128xf32, #tpu.memory_space<vmem>>, vector<4x128xf32>
    %cst_41 = arith.constant dense<0.000000e+00> : vector<8x128xf32>
    %60 = tpu.matmul %53, %54, %cst_41 {dimension_numbers = #tpu.dot_dimension_numbers<[1], [0], [0], [1], [0, 0, 1, 1], [], []>} : vector<8x32xf32>, vector<32x128xf32>, vector<8x128xf32> -> vector<8x128xf32>
    %61 = vector.broadcast %55 : vector<1x128xf32> to vector<8x128xf32>
    %62 = arith.addf %60, %61 : vector<8x128xf32>
    %cst_42 = arith.constant dense<0.000000e+00> : vector<8x128xf32>
    %63 = tpu.matmul %53, %56, %cst_42 {dimension_numbers = #tpu.dot_dimension_numbers<[1], [0], [0], [1], [0, 0, 1, 1], [], []>} : vector<8x32xf32>, vector<32x128xf32>, vector<8x128xf32> -> vector<8x128xf32>
    %64 = vector.broadcast %57 : vector<1x128xf32> to vector<8x128xf32>
    %65 = arith.addf %63, %64 : vector<8x128xf32>
    %66 = vector.shape_cast %65 : vector<8x128xf32> to vector<8x1x128xf32>
    %67 = vector.shape_cast %62 : vector<8x128xf32> to vector<1x8x128xf32>
    %68 = vector.broadcast %66 : vector<8x1x128xf32> to vector<8x8x128xf32>
    %69 = vector.broadcast %67 : vector<1x8x128xf32> to vector<8x8x128xf32>
    %70 = arith.addf %68, %69 : vector<8x8x128xf32>
    %cst_43 = arith.constant 0.000000e+00 : f32
    %71 = vector.broadcast %cst_43 : f32 to vector<8x8x128xf32>
    %72 = arith.cmpf oge, %70, %71 : vector<8x8x128xf32>
    %cst_44 = arith.constant 2.000000e-01 : f32
    %73 = vector.broadcast %cst_44 : f32 to vector<8x8x128xf32>
    %74 = arith.mulf %73, %70 : vector<8x8x128xf32>
    %75 = arith.select %72, %70, %74 : vector<8x8x128xi1>, vector<8x8x128xf32>
    %76 = vector.shape_cast %75 : vector<8x8x128xf32> to vector<64x128xf32>
    %cst_45 = arith.constant dense<0.000000e+00> : vector<64x4xf32>
    %77 = tpu.matmul %76, %58, %cst_45 {dimension_numbers = #tpu.dot_dimension_numbers<[1], [0], [0], [1], [0, 0, 1, 1], [], []>} : vector<64x128xf32>, vector<128x4xf32>, vector<64x4xf32> -> vector<64x4xf32>
    %78 = vector.shape_cast %77 : vector<64x4xf32> to vector<8x8x4xf32>
    %79 = vector.broadcast %6 : vector<8x8x1xf32> to vector<8x8x4xf32>
    %80 = arith.addf %78, %79 : vector<8x8x4xf32>
    %cst_46 = arith.constant dense<0xFF800000> : vector<8x4xf32>
    %81 = vector.multi_reduction <maximumf>, %80, %cst_46 [1] : vector<8x8x4xf32> to vector<8x4xf32>
    %82 = vector.shape_cast %81 : vector<8x4xf32> to vector<8x1x4xf32>
    %83 = vector.broadcast %82 : vector<8x1x4xf32> to vector<8x8x4xf32>
    %84 = arith.subf %80, %83 : vector<8x8x4xf32>
    %85 = math.exp %84 : vector<8x8x4xf32>
    %cst_47 = arith.constant dense<0.000000e+00> : vector<8x4xf32>
    %86 = vector.multi_reduction <add>, %85, %cst_47 [1] : vector<8x8x4xf32> to vector<8x4xf32>
    %87 = tpu.reciprocal %86 {approx = true} : vector<8x4xf32> -> vector<8x4xf32>
    %88 = vector.shape_cast %85 : vector<8x8x4xf32> to vector<64x4xf32>
    %cst_48 = arith.constant dense<0.000000e+00> : vector<64x128xf32>
    %89 = tpu.matmul %88, %59, %cst_48 {dimension_numbers = #tpu.dot_dimension_numbers<[1], [0], [0], [1], [0, 0, 1, 1], [], []>} : vector<64x4xf32>, vector<4x128xf32>, vector<64x128xf32> -> vector<64x128xf32>
    %90 = vector.shape_cast %89 : vector<64x128xf32> to vector<8x8x128xf32>
    %91 = vector.shape_cast %62 : vector<8x128xf32> to vector<1x8x128xf32>
    %92 = vector.broadcast %91 : vector<1x8x128xf32> to vector<8x8x128xf32>
    %93 = arith.mulf %90, %92 : vector<8x8x128xf32>
    %94 = vector.shape_cast %93 : vector<8x8x128xf32> to vector<64x128xf32>
    %cst_49 = arith.constant dense<0.000000e+00> : vector<8x128xf32>
    %95 = tpu.matmul %7, %94, %cst_49 {dimension_numbers = #tpu.dot_dimension_numbers<[1], [0], [0], [1], [0, 0, 1, 1], [], []>} : vector<8x64xf32>, vector<64x128xf32>, vector<8x128xf32> -> vector<8x128xf32>
    %cst_50 = arith.constant dense<0.000000e+00> : vector<8x128xf32>
    %96 = tpu.matmul %87, %59, %cst_50 {dimension_numbers = #tpu.dot_dimension_numbers<[1], [0], [0], [1], [0, 0, 1, 1], [], []>} : vector<8x4xf32>, vector<4x128xf32>, vector<8x128xf32> -> vector<8x128xf32>
    %97 = arith.mulf %95, %96 : vector<8x128xf32>
    %cst_51 = arith.constant 0.000000e+00 : f32
    %98 = vector.broadcast %cst_51 : f32 to vector<8x128xf32>
    %99 = arith.maximumf %97, %98 : vector<8x128xf32>
    %c0_52 = arith.constant 0 : index
    %c0_53 = arith.constant 0 : index
    %100 = vector.load %arg16[%c0_52, %c0_53] : memref<128x8xf32, #tpu.memory_space<vmem>>, vector<128x8xf32>
    %cst_54 = arith.constant dense<0.000000e+00> : vector<8x8xf32>
    %101 = tpu.matmul %99, %100, %cst_54 {dimension_numbers = #tpu.dot_dimension_numbers<[1], [0], [0], [1], [0, 0, 1, 1], [], []>} : vector<8x128xf32>, vector<128x8xf32>, vector<8x8xf32> -> vector<8x8xf32>
    %c0_55 = arith.constant 0 : index
    %c0_56 = arith.constant 0 : index
    %102 = vector.load %arg17[%c0_55, %c0_56] : memref<1x8xf32, #tpu.memory_space<vmem>>, vector<1x8xf32>
    %103 = vector.broadcast %102 : vector<1x8xf32> to vector<8x8xf32>
    %104 = arith.addf %101, %103 : vector<8x8xf32>
    %c0_57 = arith.constant 0 : index
    %c0_58 = arith.constant 0 : index
    %105 = vector.load %arg18[%c0_57, %c0_58] : memref<8x8xf32, #tpu.memory_space<vmem>>, vector<8x8xf32>
    tpu.vector_store %arg18[%c0_57, %c0_58], %104 {strides = array<i32>} : memref<8x8xf32, #tpu.memory_space<vmem>>, vector<8x8xf32>,
    return
  }
  func.func @transform_0(%arg0: i32) -> (i32, i32) {
    %c0_i32 = arith.constant 0 : i32
    %c0_i32_0 = arith.constant 0 : i32
    %c0_i32_1 = arith.constant 0 : i32
    return %c0_i32, %c0_i32_0 : i32, i32
  }
  func.func @transform_1(%arg0: i32) -> (i32, i32) {
    %c0_i32 = arith.constant 0 : i32
    %c0_i32_0 = arith.constant 0 : i32
    %c0_i32_1 = arith.constant 0 : i32
    return %c0_i32, %c0_i32_0 : i32, i32
  }
  func.func @transform_2(%arg0: i32) -> (i32, i32) {
    %c0_i32 = arith.constant 0 : i32
    %c0_i32_0 = arith.constant 0 : i32
    %c0_i32_1 = arith.constant 0 : i32
    return %c0_i32, %c0_i32_0 : i32, i32
  }
  func.func @transform_3(%arg0: i32) -> (i32, i32) {
    %c0_i32 = arith.constant 0 : i32
    %c0_i32_0 = arith.constant 0 : i32
    %c0_i32_1 = arith.constant 0 : i32
    return %c0_i32, %c0_i32_0 : i32, i32
  }
  func.func @transform_4(%arg0: i32) -> (i32, i32) {
    %c0_i32 = arith.constant 0 : i32
    %c0_i32_0 = arith.constant 0 : i32
    %c0_i32_1 = arith.constant 0 : i32
    return %c0_i32, %c0_i32_0 : i32, i32
  }
  func.func @transform_5(%arg0: i32) -> (i32, i32) {
    %c0_i32 = arith.constant 0 : i32
    %c0_i32_0 = arith.constant 0 : i32
    %c0_i32_1 = arith.constant 0 : i32
    return %c0_i32, %c0_i32_0 : i32, i32
  }
  func.func @transform_6(%arg0: i32) -> (i32, i32) {
    %c0_i32 = arith.constant 0 : i32
    %c0_i32_0 = arith.constant 0 : i32
    %c0_i32_1 = arith.constant 0 : i32
    return %c0_i32, %c0_i32_0 : i32, i32
  }
  func.func @transform_7(%arg0: i32) -> (i32, i32) {
    %c0_i32 = arith.constant 0 : i32
    %c0_i32_0 = arith.constant 0 : i32
    %c0_i32_1 = arith.constant 0 : i32
    return %c0_i32, %c0_i32_0 : i32, i32
  }
  func.func @transform_8(%arg0: i32) -> (i32, i32) {
    %c0_i32 = arith.constant 0 : i32
    %c0_i32_0 = arith.constant 0 : i32
    %c0_i32_1 = arith.constant 0 : i32
    return %c0_i32, %c0_i32_0 : i32, i32
  }
  func.func @transform_9(%arg0: i32) -> (i32, i32) {
    %c0_i32 = arith.constant 0 : i32
    %c0_i32_0 = arith.constant 0 : i32
    %c0_i32_1 = arith.constant 0 : i32
    return %c0_i32, %c0_i32_0 : i32, i32
  }
  func.func @transform_10(%arg0: i32) -> (i32, i32) {
    %c0_i32 = arith.constant 0 : i32
    %c0_i32_0 = arith.constant 0 : i32
    %c0_i32_1 = arith.constant 0 : i32
    return %c0_i32, %c0_i32_0 : i32, i32
  }
  func.func @transform_11(%arg0: i32) -> (i32, i32) {
    %c0_i32 = arith.constant 0 : i32
    %c0_i32_0 = arith.constant 0 : i32
    %c0_i32_1 = arith.constant 0 : i32
    return %c0_i32, %c0_i32_0 : i32, i32
  }
  func.func @transform_12(%arg0: i32) -> (i32, i32) {
    %c0_i32 = arith.constant 0 : i32
    %c0_i32_0 = arith.constant 0 : i32
    %c0_i32_1 = arith.constant 0 : i32
    return %c0_i32, %c0_i32_0 : i32, i32
  }
  func.func @transform_13(%arg0: i32) -> (i32, i32) {
    %c0_i32 = arith.constant 0 : i32
    %c0_i32_0 = arith.constant 0 : i32
    %c0_i32_1 = arith.constant 0 : i32
    return %c0_i32, %c0_i32_0 : i32, i32
  }
  func.func @transform_14(%arg0: i32) -> (i32, i32) {
    %c0_i32 = arith.constant 0 : i32
    %c0_i32_0 = arith.constant 0 : i32
    %c0_i32_1 = arith.constant 0 : i32
    return %c0_i32, %c0_i32_0 : i32, i32
  }
  func.func @transform_15(%arg0: i32) -> (i32, i32) {
    %c0_i32 = arith.constant 0 : i32
    %c0_i32_0 = arith.constant 0 : i32
    %c0_i32_1 = arith.constant 0 : i32
    return %c0_i32, %c0_i32_0 : i32, i32
  }
  func.func @transform_16(%arg0: i32) -> (i32, i32) {
    %c0_i32 = arith.constant 0 : i32
    %c0_i32_0 = arith.constant 0 : i32
    %c0_i32_1 = arith.constant 0 : i32
    return %c0_i32, %c0_i32_0 : i32, i32
  }
  func.func @transform_17(%arg0: i32) -> (i32, i32) {
    %c0_i32 = arith.constant 0 : i32
    %c0_i32_0 = arith.constant 0 : i32
    %c0_i32_1 = arith.constant 0 : i32
    return %c0_i32, %c0_i32_0 : i32, i32
  }
}

</mosaic_0001>

<bundles_post_ra>
// kernel: gat_forward.1
= control target key start
LH: loop header
LB: loop body
LE: loop exit
PB: predicated region body
PF: predicated region fallthrough
CT: control target
= control target key end

     0   :  { %s2974_s0 = inlined_call_operand.vmem [shape: f32[8,16], index: 0, kind: input, shape index: {}]   ;;  %s2975_s1 = inlined_call_operand.vmem [shape: f32[8,8], index: 1, kind: input, shape index: {}]   ;;  %s2976_s2 = inlined_call_operand.vmem [shape: f32[16,32], index: 2, kind: input, shape index: {}]   ;;  %s2977_s3 = inlined_call_operand.vmem [shape: f32[1,32], index: 3, kind: input, shape index: {}]   ;;  %s2978_s4 = inlined_call_operand.vmem [shape: f32[16,32], index: 4, kind: input, shape index: {}]   ;;  %s2979_s5 = inlined_call_operand.vmem [shape: f32[1,32], index: 5, kind: input, shape index: {}]   ;;  %s2980_s6 = inlined_call_operand.vmem [shape: f32[32,4], index: 6, kind: input, shape index: {}]   ;;  %s2981_s7 = inlined_call_operand.vmem [shape: f32[4,32], index: 7, kind: input, shape index: {}]   ;;  %s2982_s8 = inlined_call_operand.vmem [shape: f32[32,128], index: 8, kind: input, shape index: {}]   ;;  %s2983_s9 = inlined_call_operand.vmem [shape: f32[1,128], index: 9, kind: input, shape index: {}]   ;;  %s2984_s10 = inlined_call_operand.vmem [shape: f32[32,128], index: 10, kind: input, shape index: {}]   ;;  %s2985_s11 = inlined_call_operand.vmem [shape: f32[1,128], index: 11, kind: input, shape index: {}]   ;;  %s2986_s12 = inlined_call_operand.vmem [shape: f32[128,4], index: 12, kind: input, shape index: {}]   ;;  %s2987_s13 = inlined_call_operand.vmem [shape: f32[4,128], index: 13, kind: input, shape index: {}]   ;;  %s2988_s14 = inlined_call_operand.vmem [shape: f32[8,64], index: 14, kind: input, shape index: {}]   ;;  %s2989_s15 = inlined_call_operand.vmem [shape: f32[128,8], index: 15, kind: input, shape index: {}]   ;;  %s2990_s16 = inlined_call_operand.vmem [shape: f32[1,8], index: 16, kind: input, shape index: {}]   ;;  %s2991_s17 = inlined_call_operand.hbm [shape: f32[8,8], index: 17, kind: output, shape index: {}]  }
   0x1   :  { %2992 = sst [smem:[#allocation5_spill]] %s2974_s0 }
   0x2   :  { %2993 = sst [smem:[#allocation6_spill]] %s2975_s1 }
   0x3   :  { %v122_v0 = vld [vmem:[%s2978_s4 + $0x8] sm:$0xff]  ;;  %v2422_v1 = vmov 0.0   ;;  %v121_v2 = vld [vmem:[%s2978_s4] sm:$0xff]  ;;  %vm2423_vm0 = vmmov 0   ;;  %s2994_s18 = sld [smem:[#allocation5_spill]]  ;;  %vm135_vm1 = vcmask 130048  }
   0x4   :  { %2128 = vmatprep.subr.mxu1 %v2422_v1  ;;  %2132 = vmatprep.mubr.msk.f32.mxu1 %vm2423_vm0, %v2422_v1  ;;  %v119_v3 = vld [vmem:[%s2976_s2 + $0x8] sm:$0xff]  ;;  %v118_v5 = vld [vmem:[%s2976_s2] sm:$0xff] }
   0x5   :  { %2129 = vmatpush3.msra.mxu1 %v122_v0  ;;  %2121 = vmatprep.subr.mxu0 %v2422_v1 }
   0x9   :  { %v57_v4 = vld [vmem:[%s2994_s18] sm:$0xff] }
   0xa   :  { %22 = vsyncpa [#allocation3], 0  ;;  %2130 = vmatprep.subr.mxu1 %v2422_v1  ;;  %2122 = vmatpush3.msra.mxu0 %v119_v3  ;;  %v127_v6 = vld [vmem:[%s2980_s6 + $0x18] sm:$0xff]  ;;  %v126_v7 = vld [vmem:[%s2980_s6 + $0x10] sm:$0xff]  ;;  %v61_v10 = vlaneseq  ;;  %s2995_s28 = sld [smem:[#allocation6_spill]]  ;;  %vm407_vm2 = vcmask 261120  }
   0xb   :  { %2131 = vmatpush3.msra.mxu1 %v121_v2  ;;  %2123 = vmatprep.subr.mxu0 %v2422_v1  ;;  %v125_v8 = vld [vmem:[%s2980_s6 + $0x8] sm:$0xff]  ;;  %v124_v9 = vld [vmem:[%s2980_s6] sm:$0xff]  ;;  %v2424_v31 = vmov 1966171168   ;;  %vm714_vm11 = vcmask 1043456   ;;  %vm545_vm12 = vcmask 31744  }
   0xc   :  { %2133 = vmatmul.mubr.msk.f32.vlgmr.msra.gmra.mxu1 %vm135_vm1, %v57_v4  ;;  %2124 = vmatpush3.msra.mxu0 %v118_v5  ;;  %v62_v11 = vshrl.u32 %v61_v10, 7  ;;  %v288_v32 = vunpack.c.l.s4 %v2424_v31  ;;  %v1973_v34 = vld [vmem:[%s2979_s5] ss:$0 sm:$0xff]  ;;  %vm913_vm13 = vcmask 1041409   ;;  %vm915_vm14 = vcmask 1042434   ;;  %s2425_s23 = smov [#allocation2]  }
   0xd   :  { %2125 = vmatprep.mubr.msk.f32.mxu0 %vm2423_vm0, %v2422_v1  ;;  %2135 = vmatprep.subr.mxu0 %v127_v6  ;;  %v1971_v42 = vld [vmem:[%s2977_s3] ss:$0 sm:$0xff]  ;;  %vm917_vm15 = vcmask 1043459   ;;  %s1962_s24 = sshll.u32 %s2425_s23, 4  ;;  %s1963_s24 = int_to_ptr.vmem [resolvable:$true] %s1962_s24 }
   0xe   :  { %2126 = vmatmul.mubr.msk.f32.vlgmr.msra.gmra.mxu0 %vm135_vm1, %v57_v4  ;;  %v77_v14 = vsub.s32 2, %v62_v11  ;;  %v2555_v15 = vsub.s32 0, %v62_v11  ;;  %v70_v17 = vsub.s32 1, %v62_v11  ;;  %v84_v18 = vsub.s32 3, %v62_v11  ;;  %p2405_p1 = scmp.lt.s32.totalorder %s1963_s24, %s1963_s24 }
   0xf   :  { %2136 = vmatpush3.msra.mxu0 %v127_v6  ;;  %v98_v23 = vsub.s32 5, %v62_v11  ;;  %v91_v24 = vsub.s32 4, %v62_v11  ;;  %v112_v27 = vsub.s32 7, %v62_v11  ;;  %v105_v28 = vsub.s32 6, %v62_v11 }
  0x10   :  { %2137 = vmatprep.subr.mxu0 %v126_v7  ;;  %v58_v12 = vld [vmem:[%s2995_s28] sm:$0xff]  ;;  %v289_v33 = vunpack.c.0.s8 %v288_v32  ;;  %vm919_vm1 = vcmask 1044484  }
  0x11   :  { %2138 = vmatpush3.msra.mxu0 %v126_v7  ;;  %v1970_v13 = vadd.f32 -1.0, %v58_v12 }
  0x12   :  { %2139 = vmatprep.subr.mxu0 %v125_v8  ;;  %v2561_v35 = vsub.s32 %v289_v33, %v62_v11 }
  0x13   :  { %2140 = vmatpush3.msra.mxu0 %v125_v8  ;;  %v60_v16 = vmul.f32 1e+30, %v1970_v13 }
  0x14   :  { %2141 = vmatprep.subr.mxu0 %v124_v9 }
  0x15   :  { %2142 = vmatpush3.msra.mxu0 %v124_v9  ;;  %v64_v19 = vrot.slane %v60_v16, %v2555_v15  ;;  %v78_v20 = vrot.slane %v60_v16, %v77_v14  ;;  %v71_v21 = vrot.slane %v60_v16, %v70_v17  ;;  %v85_v22 = vrot.slane %v60_v16, %v84_v18 }
  0x16   :  { %2204 = vmatprep.subr.mxu0 %v2422_v1  ;;  %v99_v25 = vrot.slane %v60_v16, %v98_v23  ;;  %v92_v26 = vrot.slane %v60_v16, %v91_v24  ;;  %v113_v29 = vrot.slane %v60_v16, %v112_v27  ;;  %v106_v30 = vrot.slane %v60_v16, %v105_v28 }
  0x17   :  { %66 = vbcast.lane.b32.xlu0 %v64_v19, 256  ;;  %80 = vbcast.lane.b32.xlu1 %v78_v20, 256 }
  0x1b   :  { %73 = vbcast.lane.b32.xlu0 %v71_v21, 256  ;;  %87 = vbcast.lane.b32.xlu1 %v85_v22, 256 }
  0x1f   :  { %101 = vbcast.lane.b32.xlu1 %v99_v25, 256  ;;  %94 = vbcast.lane.b32.xlu0 %v92_v26, 256  ;;  %v2603_v26 = vld [vmem:[%s2981_s7] sm:$0xf] }
  0x20   :  { %2155 = vmatprep.subr.msk.mxu1 %vm714_vm11, %v2603_v26 }
  0x21   :  { %2156 = vmatpush3.msk.msra.mxu1 %vm714_vm11, %v2603_v26 }
  0x22   :  { %2169 = vmatprep.subr.mxu1 %v2422_v1 }
  0x23   :  { %115 = vbcast.lane.b32.xlu1 %v113_v29, 256  ;;  %108 = vbcast.lane.b32.xlu0 %v106_v30, 256 }
  0x89   :  { %v2610_v27 = vpop.permute.xlu0 %66  ;;  %v2612_v28 = vpop.permute.xlu1 %80 }
  0x8d   :  { %v2614_v29 = vpop.permute.xlu0 %73  ;;  %v2616_v30 = vpop.permute.xlu1 %87 }
  0xcc   :  { %v281_v36 = vpop.f32.mrf.mxu1 }
  0xcd   :  { %v282_v37 = vadd.f32 %v1973_v34, %v281_v36 }
  0xce   :  { %v2134_v38 = vpop.f32.mrf.mxu1  ;;  %v205_v39 = vpop.f32.mrf.mxu0 }
  0xcf   :  { %v286_v40 = vcombine.high %v282_v37, %v282_v37  ;;  %v293_v41 = vrot.slane %v282_v37, %v2561_v35  ;;  %v2569_v47 = vadd.f32 %v1971_v42, %v205_v39  ;;  %v2621_v39 = vpop.permute.xlu1 %101 }
  0xd0   :  { %v2127_v43 = vpop.f32.mrf.mxu0 }
  0xd1   :  { %v300_v44 = vrot.slane %v286_v40, %v2561_v35  ;;  %v301_v45 = vcombine.high %v293_v41, %v293_v41  ;;  %v309_v46 = vrot.slane %v293_v41, %v2561_v35 }
  0xd3   :  { %v302_v48 = vcombine.high %v300_v44, %v300_v44  ;;  %v316_v49 = vrot.slane %v300_v44, %v2561_v35  ;;  %v323_v50 = vrot.slane %v301_v45, %v2561_v35  ;;  %v331_v51 = vcombine.high %v309_v46, %v309_v46  ;;  %v2627_v45 = vpop.permute.xlu0 %94 }
  0xd4   :  { %v338_v52 = vrot.slane %v309_v46, %v2555_v15 }
  0xd5   :  { %v330_v53 = vrot.slane %v302_v48, %v2561_v35  ;;  %v333_v54 = vcombine.high %v323_v50, %v323_v50  ;;  %v342_v55 = vrot.slane %v323_v50, %v2555_v15  ;;  %v346_v56 = vrot.slane %v331_v51, %v2555_v15 }
  0xd6   :  { %v354_v57 = vrot.slane %v316_v49, %v2555_v15  ;;  %v375_v58 = vadd.f32 %v338_v52, %v2569_v47  ;;  %v332_v59 = vcombine.high %v316_v49, %v316_v49 }
  0xd7   :  { %v376_v60 = vadd.f32 %v342_v55, %v2569_v47  ;;  %v350_v61 = vrot.slane %v333_v54, %v2555_v15  ;;  %v358_v62 = vrot.slane %v330_v53, %v2555_v15  ;;  %v377_v0 = vadd.f32 %v346_v56, %v2569_v47 }
  0xd8   :  { %vm383_vm3 = vcmp.ge.f32.partialorder %v375_v58, 0.0  ;;  %v391_v63 = vmul.f32 0.2, %v375_v58  ;;  %v379_v2 = vadd.f32 %v354_v57, %v2569_v47  ;;  %v334_v3 = vcombine.high %v330_v53, %v330_v53 }
  0xd9   :  { %vm384_vm4 = vcmp.ge.f32.partialorder %v376_v60, 0.0  ;;  %v392_v4 = vmul.f32 0.2, %v376_v60  ;;  %v378_v5 = vadd.f32 %v350_v61, %v2569_v47  ;;  %vm385_vm5 = vcmp.ge.f32.partialorder %v377_v0, 0.0 }
  0xda   :  { %v399_v6 = vsel %vm383_vm3, %v375_v58, %v391_v63  ;;  %v393_v7 = vmul.f32 0.2, %v377_v0  ;;  %v380_v10 = vadd.f32 %v358_v62, %v2569_v47  ;;  %v395_v12 = vmul.f32 0.2, %v379_v2 }
  0xdb   :  { %2143 = vmatprep.mubr.msk.f32.mxu0 %vm407_vm2, %v399_v6  ;;  %v400_v8 = vsel %vm384_vm4, %v376_v60, %v392_v4  ;;  %v394_v9 = vmul.f32 0.2, %v378_v5  ;;  %vm386_vm6 = vcmp.ge.f32.partialorder %v378_v5, 0.0  ;;  %v362_v13 = vrot.slane %v332_v59, %v2555_v15  ;;  %v2639_v60 = vpop.permute.xlu1 %115 }
  0xdc   :  { %2144 = vmatmul.mubr.msk.f32.vlgmr.msra.gmra.mxu0 %vm407_vm2, %v400_v8  ;;  %v401_v11 = vsel %vm385_vm5, %v377_v0, %v393_v7  ;;  %vm387_vm7 = vcmp.ge.f32.partialorder %v379_v2, 0.0  ;;  %v366_v14 = vrot.slane %v334_v3, %v2555_v15  ;;  %v396_v18 = vmul.f32 0.2, %v380_v10 }
  0xdd   :  { %2146 = vmatprep.mubr.msk.f32.mxu0 %vm407_vm2, %v401_v11  ;;  %v381_v16 = vadd.f32 %v362_v13, %v2569_v47  ;;  %v402_v17 = vsel %vm386_vm6, %v378_v5, %v394_v9  ;;  %v403_v20 = vsel %vm387_vm7, %v379_v2, %v395_v12  ;;  %vm388_vm8 = vcmp.ge.f32.partialorder %v380_v10, 0.0  ;;  %v2644_v5 = vpop.permute.xlu0 %108 }
  0xde   :  { %v382_v19 = vadd.f32 %v366_v14, %v2569_v47  ;;  %v404_v22 = vsel %vm388_vm8, %v380_v10, %v396_v18  ;;  %vm921_vm3 = vcmask 1045509   ;;  %vm923_vm4 = vcmask 1046534  }
  0xdf   :  { %v397_v21 = vmul.f32 0.2, %v381_v16  ;;  %vm389_vm9 = vcmp.ge.f32.partialorder %v381_v16, 0.0  ;;  %vm925_vm5 = vcmask 1047559   ;;  %vm831_vm6 = vcmask 523264  }
  0xe0   :  { %2147 = vmatmul.mubr.msk.f32.gmra.mxu0 %vm407_vm2, %v402_v17  ;;  %v398_v23 = vmul.f32 0.2, %v382_v19  ;;  %vm390_vm10 = vcmp.ge.f32.partialorder %v382_v19, 0.0 }
  0xe1   :  { %2149 = vmatprep.mubr.msk.f32.mxu0 %vm407_vm2, %v403_v20  ;;  %v405_v24 = vsel %vm389_vm9, %v381_v16, %v397_v21 }
  0xe2   :  { %v406_v25 = vsel %vm390_vm10, %v382_v19, %v398_v23 }
  0xe4   :  { %2150 = vmatmul.mubr.msk.f32.gmra.mxu0 %vm407_vm2, %v404_v22 }
  0xe5   :  { %2152 = vmatprep.mubr.msk.f32.mxu0 %vm407_vm2, %v405_v24 }
  0xe8   :  { %2153 = vmatmul.mubr.msk.f32.gmra.mxu0 %vm407_vm2, %v406_v25 }
  0xe9   :  { %2212 = vmatprep.mubr.msk.f32.mxu0 %vm2423_vm0, %v2422_v1 }
 0x19c   :  { %v2145_v31 = vpop.f32.mrf.mxu0 }
 0x19d   :  { %v538_v32 = vadd.f32 %v2145_v31, %v2614_v29 }
 0x19e   :  { %v498_v33 = vpop.f32.mrf.mxu0 }
 0x19f   :  { %v553_v34 = vsel %vm545_vm12, %v538_v32, -inf  ;;  %v537_v36 = vadd.f32 %v498_v33, %v2610_v27 }
 0x1a0   :  { %v554_v37 = vrot.slane %v553_v34, 4  ;;  %v2148_v38 = vpop.f32.mrf.mxu0 }
 0x1a1   :  { %v546_v40 = vsel %vm545_vm12, %v537_v36, -inf  ;;  %v2625_v41 = vadd.f32 %v2148_v38, %v2616_v30 }
 0x1a2   :  { %v555_v42 = vmax.f32 %v553_v34, %v554_v37  ;;  %v547_v43 = vrot.slane %v546_v40, 4  ;;  %v508_v44 = vpop.f32.mrf.mxu0 }
 0x1a3   :  { %v567_v46 = vsel %vm545_vm12, %v2625_v41, -inf  ;;  %v2632_v48 = vadd.f32 %v508_v44, %v2612_v28 }
 0x1a4   :  { %v556_v49 = vrot.slane %v555_v42, 2  ;;  %v548_v50 = vmax.f32 %v546_v40, %v547_v43  ;;  %v568_v51 = vrot.slane %v567_v46, 4  ;;  %v2151_v52 = vpop.f32.mrf.mxu0 }
 0x1a5   :  { %v560_v53 = vsel %vm545_vm12, %v2632_v48, -inf  ;;  %v2637_v54 = vadd.f32 %v2151_v52, %v2621_v39 }
 0x1a6   :  { %v557_v55 = vmax.f32 %v555_v42, %v556_v49  ;;  %v549_v56 = vrot.slane %v548_v50, 2  ;;  %v569_v57 = vmax.f32 %v567_v46, %v568_v51  ;;  %v561_v58 = vrot.slane %v560_v53, 4  ;;  %v518_v59 = vpop.f32.mrf.mxu0 }
 0x1a7   :  { %v581_v61 = vsel %vm545_vm12, %v2637_v54, -inf  ;;  %v541_v62 = vadd.f32 %v518_v59, %v2627_v45 }
 0x1a8   :  { %v558_v63 = vrot.slane %v557_v55, 1  ;;  %v550_v0 = vmax.f32 %v548_v50, %v549_v56  ;;  %v570_v2 = vrot.slane %v569_v57, 2  ;;  %v562_v3 = vmax.f32 %v560_v53, %v561_v58  ;;  %v2154_v4 = vpop.f32.mrf.mxu0 }
 0x1a9   :  { %v582_v6 = vrot.slane %v581_v61, 4  ;;  %v574_v7 = vsel %vm545_vm12, %v541_v62, -inf  ;;  %v544_v8 = vadd.f32 %v2154_v4, %v2639_v60 }
 0x1aa   :  { %v559_v9 = vmax.f32 %v557_v55, %v558_v63  ;;  %v551_v10 = vrot.slane %v550_v0, 1  ;;  %v571_v11 = vmax.f32 %v569_v57, %v570_v2  ;;  %v563_v12 = vrot.slane %v562_v3, 2  ;;  %v528_v13 = vpop.f32.mrf.mxu0 }
 0x1ab   :  { %v583_v14 = vmax.f32 %v581_v61, %v582_v6  ;;  %v575_v16 = vrot.slane %v574_v7, 4  ;;  %v595_v17 = vsel %vm545_vm12, %v544_v8, -inf  ;;  %v543_v18 = vadd.f32 %v528_v13, %v2644_v5 }
 0x1ac   :  { %v603_v19 = vsub.f32 %v538_v32, %v559_v9  ;;  %v552_v20 = vmax.f32 %v550_v0, %v551_v10  ;;  %v572_v21 = vrot.slane %v571_v11, 1  ;;  %v564_v22 = vmax.f32 %v562_v3, %v563_v12 }
 0x1ad   :  { %v584_v23 = vrot.slane %v583_v14, 2  ;;  %v576_v24 = vmax.f32 %v574_v7, %v575_v16  ;;  %v596_v25 = vrot.slane %v595_v17, 4  ;;  %v588_v31 = vsel %vm545_vm12, %v543_v18, -inf }
 0x1ae   :  { %v612_v33 = vmul.f32 1.442695, %v603_v19  ;;  %v602_v34 = vsub.f32 %v537_v36, %v552_v20  ;;  %v573_v37 = vmax.f32 %v571_v11, %v572_v21  ;;  %v565_v38 = vrot.slane %v564_v22, 1 }
 0x1af   :  { %v585_v40 = vmax.f32 %v583_v14, %v584_v23  ;;  %v577_v42 = vrot.slane %v576_v24, 2  ;;  %v597_v43 = vmax.f32 %v595_v17, %v596_v25  ;;  %v589_v44 = vrot.slane %v588_v31, 4 }
 0x1b0   :  { %2336 = vpow2.f32 %v612_v33  ;;  %v610_v46 = vmul.f32 1.442695, %v602_v34  ;;  %v605_v32 = vsub.f32 %v2625_v41, %v573_v37  ;;  %v566_v49 = vmax.f32 %v564_v22, %v565_v38 }
 0x1b1   :  { %v586_v50 = vrot.slane %v585_v40, 1  ;;  %v578_v51 = vmax.f32 %v576_v24, %v577_v42  ;;  %v598_v52 = vrot.slane %v597_v43, 2  ;;  %v590_v53 = vmax.f32 %v588_v31, %v589_v44 }
 0x1b2   :  { %2338 = vpow2.f32 %v610_v46  ;;  %v616_v55 = vmul.f32 1.442695, %v605_v32  ;;  %v604_v56 = vsub.f32 %v2632_v48, %v566_v49 }
 0x1b3   :  { %v587_v36 = vmax.f32 %v585_v40, %v586_v50  ;;  %v579_v57 = vrot.slane %v578_v51, 1  ;;  %v599_v58 = vmax.f32 %v597_v43, %v598_v52  ;;  %v591_v59 = vrot.slane %v590_v53, 2 }
 0x1b4   :  { %2340 = vpow2.f32 %v616_v55  ;;  %v614_v61 = vmul.f32 1.442695, %v604_v56 }
 0x1b5   :  { %v607_v63 = vsub.f32 %v2637_v54, %v587_v36  ;;  %v580_v0 = vmax.f32 %v578_v51, %v579_v57  ;;  %v600_v2 = vrot.slane %v599_v58, 1  ;;  %v592_v41 = vmax.f32 %v590_v53, %v591_v59 }
 0x1b6   :  { %2342 = vpow2.f32 %v614_v61 }
 0x1b7   :  { %v620_v3 = vmul.f32 1.442695, %v607_v63  ;;  %v606_v4 = vsub.f32 %v541_v62, %v580_v0  ;;  %v601_v6 = vmax.f32 %v599_v58, %v600_v2  ;;  %v593_v7 = vrot.slane %v592_v41, 1 }
 0x1b9   :  { %2344 = vpow2.f32 %v620_v3  ;;  %v618_v9 = vmul.f32 1.442695, %v606_v4  ;;  %v609_v10 = vsub.f32 %v544_v8, %v601_v6  ;;  %v594_v48 = vmax.f32 %v592_v41, %v593_v7 }
 0x1bb   :  { %2346 = vpow2.f32 %v618_v9  ;;  %v624_v11 = vmul.f32 1.442695, %v609_v10  ;;  %v608_v12 = vsub.f32 %v543_v18, %v594_v48 }
 0x1bd   :  { %v2337_v13 = vpop.eup %2336  ;;  %2348 = vpow2.f32 %v624_v11  ;;  %v622_v14 = vmul.f32 1.442695, %v608_v12 }
 0x1be   :  { %v633_v54 = vsel %vm545_vm12, %v2337_v13, 0.0 }
 0x1bf   :  { %v2339_v16 = vpop.eup %2338  ;;  %v634_v17 = vrot.slane %v633_v54, 4  ;;  %2350 = vpow2.f32 %v622_v14 }
 0x1c0   :  { %v626_v19 = vsel %vm545_vm12, %v2339_v16, 0.0  ;;  %2157 = vmatprep.mubr.msk.f32.mxu1 %vm545_vm12, %v2339_v16 }
 0x1c1   :  { %v2341_v62 = vpop.eup %2340  ;;  %v635_v20 = vadd.f32 %v634_v17, %v633_v54  ;;  %v627_v21 = vrot.slane %v626_v19, 4  ;;  %2158 = vmatmul.mubr.msk.f32.vlgmr.msra.gmra.mxu1 %vm545_vm12, %v2337_v13 }
 0x1c2   :  { %v647_v8 = vsel %vm545_vm12, %v2341_v62, 0.0 }
 0x1c3   :  { %v2343_v18 = vpop.eup %2342  ;;  %v636_v22 = vrot.slane %v635_v20, 2  ;;  %v628_v23 = vadd.f32 %v627_v21, %v626_v19  ;;  %v648_v24 = vrot.slane %v647_v8, 4 }
 0x1c4   :  { %v640_v25 = vsel %vm545_vm12, %v2343_v18, 0.0  ;;  %2160 = vmatprep.mubr.msk.f32.mxu1 %vm545_vm12, %v2343_v18 }
 0x1c5   :  { %v637_v31 = vadd.f32 %v636_v22, %v635_v20  ;;  %v629_v33 = vrot.slane %v628_v23, 2  ;;  %v649_v34 = vadd.f32 %v648_v24, %v647_v8  ;;  %v641_v37 = vrot.slane %v640_v25, 4  ;;  %2161 = vmatmul.mubr.msk.f32.gmra.mxu1 %vm545_vm12, %v2341_v62 }
 0x1c6   :  { %v2345_v38 = vpop.eup %2344 }
 0x1c7   :  { %v638_v40 = vrot.slane %v637_v31, 1  ;;  %v630_v42 = vadd.f32 %v629_v33, %v628_v23  ;;  %v650_v43 = vrot.slane %v649_v34, 2  ;;  %v642_v44 = vadd.f32 %v641_v37, %v640_v25 }
 0x1c8   :  { %v2347_v46 = vpop.eup %2346  ;;  %v661_v32 = vsel %vm545_vm12, %v2345_v38, 0.0 }
 0x1c9   :  { %v639_v49 = vadd.f32 %v638_v40, %v637_v31  ;;  %v631_v50 = vrot.slane %v630_v42, 1  ;;  %v651_v51 = vadd.f32 %v650_v43, %v649_v34  ;;  %v643_v52 = vrot.slane %v642_v44, 2  ;;  %2163 = vmatprep.mubr.msk.f32.mxu1 %vm545_vm12, %v2347_v46 }
 0x1ca   :  { %v2349_v53 = vpop.eup %2348  ;;  %v662_v55 = vrot.slane %v661_v32, 4  ;;  %v654_v56 = vsel %vm545_vm12, %v2347_v46, 0.0  ;;  %2164 = vmatmul.mubr.msk.f32.gmra.mxu1 %vm545_vm12, %v2345_v38 }
 0x1cb   :  { %v632_v36 = vadd.f32 %v631_v50, %v630_v42  ;;  %v652_v57 = vrot.slane %v651_v51, 1  ;;  %v644_v58 = vadd.f32 %v643_v52, %v642_v44  ;;  %2352 = vrcp.f32 %v639_v49  ;;  %v1009_v52 = vld [vmem:[%s2984_s10 + $0x18] sm:$0xff] }
 0x1cc   :  { %v2351_v59 = vpop.eup %2350  ;;  %v663_v61 = vadd.f32 %v662_v55, %v661_v32  ;;  %v655_v63 = vrot.slane %v654_v56, 4  ;;  %v675_v0 = vsel %vm545_vm12, %v2349_v53, 0.0  ;;  %2205 = vmatpush3.msra.mxu0 %v1009_v52 }
 0x1cd   :  { %2354 = vrcp.f32 %v632_v36  ;;  %v645_v2 = vrot.slane %v644_v58, 1  ;;  %v676_v41 = vrot.slane %v675_v0, 4  ;;  %2166 = vmatprep.mubr.msk.f32.mxu1 %vm545_vm12, %v2351_v59  ;;  %v653_v3 = vadd.f32 %v652_v57, %v651_v51  ;;  %2206 = vmatprep.subr.mxu0 %v2422_v1 }
 0x1ce   :  { %v664_v4 = vrot.slane %v663_v61, 2  ;;  %v656_v6 = vadd.f32 %v655_v63, %v654_v56  ;;  %v668_v7 = vsel %vm545_vm12, %v2351_v59, 0.0  ;;  %2167 = vmatmul.mubr.msk.f32.gmra.mxu1 %vm545_vm12, %v2349_v53  ;;  %v1008_v53 = vld [vmem:[%s2984_s10 + $0x10] sm:$0xff] }
 0x1cf   :  { %v646_v9 = vadd.f32 %v645_v2, %v644_v58  ;;  %v677_v10 = vadd.f32 %v676_v41, %v675_v0  ;;  %v669_v48 = vrot.slane %v668_v7, 4  ;;  %2185 = vmatprep.mubr.msk.f32.mxu1 %vm2423_vm0, %v2422_v1  ;;  %2207 = vmatpush3.msra.mxu0 %v1008_v53 }
 0x1d0   :  { %v665_v11 = vadd.f32 %v664_v4, %v663_v61  ;;  %v657_v12 = vrot.slane %v656_v6, 2  ;;  %2208 = vmatprep.subr.mxu0 %v2422_v1 }
 0x1d1   :  { %2356 = vrcp.f32 %v646_v9  ;;  %v678_v13 = vrot.slane %v677_v10, 2  ;;  %v670_v14 = vadd.f32 %v669_v48, %v668_v7  ;;  %v1007_v48 = vld [vmem:[%s2984_s10 + $0x8] sm:$0xff] }
 0x1d2   :  { %2358 = vrcp.f32 %v653_v3  ;;  %v666_v54 = vrot.slane %v665_v11, 1  ;;  %v658_v16 = vadd.f32 %v657_v12, %v656_v6  ;;  %2209 = vmatpush3.msra.mxu0 %v1007_v48  ;;  %v1006_v12 = vld [vmem:[%s2984_s10] sm:$0xff] }
 0x1d3   :  { %v679_v17 = vadd.f32 %v678_v13, %v677_v10  ;;  %v671_v19 = vrot.slane %v670_v14, 2  ;;  %v2704_v10 = vld [vmem:[%s2988_s14] sm:$0xff]  ;;  %2210 = vmatprep.subr.mxu0 %v2422_v1 }
 0x1d4   :  { %v659_v62 = vrot.slane %v658_v16, 1  ;;  %v667_v20 = vadd.f32 %v666_v54, %v665_v11  ;;  %v1002_v11 = vld [vmem:[%s2982_s8 + $0x8] sm:$0xff]  ;;  %2211 = vmatpush3.msra.mxu0 %v1006_v12  ;;  %v1001_v13 = vld [vmem:[%s2982_s8] sm:$0xff] }
 0x1d5   :  { %v680_v21 = vrot.slane %v679_v17, 1  ;;  %v672_v8 = vadd.f32 %v671_v19, %v670_v14  ;;  %v1026_v14 = vld [vmem:[%s2986_s12 + $0x78] sm:$0xff] }
 0x1d6   :  { %v660_v18 = vadd.f32 %v659_v62, %v658_v16 }
 0x1d7   :  { %v673_v22 = vrot.slane %v672_v8, 1  ;;  %v681_v23 = vadd.f32 %v680_v21, %v679_v17  ;;  %v1025_v21 = vld [vmem:[%s2986_s12 + $0x70] sm:$0xff] }
 0x1d8   :  { %2360 = vrcp.f32 %v660_v18  ;;  %v2353_v24 = vpop.eup %2352  ;;  %v1023_v18 = vld [vmem:[%s2986_s12 + $0x60] sm:$0xff] }
 0x1d9   :  { %2362 = vrcp.f32 %v667_v20  ;;  %v674_v25 = vadd.f32 %v673_v22, %v672_v8  ;;  %v1024_v8 = vld [vmem:[%s2986_s12 + $0x68] sm:$0xff]  ;;  %v1022_v22 = vld [vmem:[%s2986_s12 + $0x58] sm:$0xff] }
 0x1da   :  { %v2355_v31 = vpop.eup %2354 }
 0x1db   :  { %2364 = vrcp.f32 %v674_v25  ;;  %v914_v33 = vsel %vm913_vm13, %v2353_v24, %v2355_v31  ;;  %v1020_v24 = vld [vmem:[%s2986_s12 + $0x48] sm:$0xff]  ;;  %v1019_v25 = vld [vmem:[%s2986_s12 + $0x40] sm:$0xff]  ;;  %v1018_v31 = vld [vmem:[%s2986_s12 + $0x38] sm:$0xff] }
 0x1dc   :  { %2366 = vrcp.f32 %v681_v23  ;;  %v1021_v23 = vld [vmem:[%s2986_s12 + $0x50] sm:$0xff] }
 0x1de   :  { %v2357_v34 = vpop.eup %2356 }
 0x1df   :  { %v2359_v37 = vpop.eup %2358  ;;  %v916_v38 = vsel %vm915_vm14, %v2357_v34, %v914_v33  ;;  %v1017_v33 = vld [vmem:[%s2986_s12 + $0x30] sm:$0xff]  ;;  %v1016_v34 = vld [vmem:[%s2986_s12 + $0x28] sm:$0xff] }
 0x1e0   :  { %v918_v40 = vsel %vm917_vm15, %v2359_v37, %v916_v38  ;;  %v1015_v37 = vld [vmem:[%s2986_s12 + $0x20] sm:$0xff]  ;;  %v1014_v38 = vld [vmem:[%s2986_s12 + $0x18] sm:$0xff] }
 0x1e5   :  { %v2361_v42 = vpop.eup %2360 }
 0x1e6   :  { %v2363_v43 = vpop.eup %2362  ;;  %v920_v44 = vsel %vm919_vm1, %v2361_v42, %v918_v40  ;;  %v1013_v40 = vld [vmem:[%s2986_s12 + $0x10] sm:$0xff]  ;;  %v1012_v42 = vld [vmem:[%s2986_s12 + $0x8] sm:$0xff] }
 0x1e7   :  { %v922_v46 = vsel %vm921_vm3, %v2363_v43, %v920_v44  ;;  %v1011_v43 = vld [vmem:[%s2986_s12] sm:$0xff] }
 0x1e8   :  { %v2365_v32 = vpop.eup %2364  ;;  %v1997_v44 = vld [vmem:[%s2985_s11] ss:$0 sm:$0xff] }
 0x1e9   :  { %v2367_v49 = vpop.eup %2366  ;;  %v924_v50 = vsel %vm923_vm4, %v2365_v32, %v922_v46 }
 0x1ea   :  { %v926_v51 = vsel %vm925_vm5, %v2367_v49, %v924_v50 }
 0x281   :  { %v2159_v55 = vpop.f32.mrf.mxu1 }
 0x282   :  { %v824_v7 = vmul.f32 %v2159_v55, %v2569_v47  ;;  %v1995_v55 = vld [vmem:[%s2983_s9] ss:$0 sm:$0xff] }
 0x283   :  { %v784_v56 = vpop.f32.mrf.mxu1 }
 0x284   :  { %v823_v9 = vmul.f32 %v784_v56, %v2569_v47 }
 0x285   :  { %v2162_v36 = vpop.f32.mrf.mxu1 }
 0x286   :  { %v826_v4 = vmul.f32 %v2162_v36, %v2569_v47 }
 0x287   :  { %v794_v57 = vpop.f32.mrf.mxu1 }
 0x288   :  { %v825_v6 = vmul.f32 %v794_v57, %v2569_v47 }
 0x28a   :  { %v2165_v58 = vpop.f32.mrf.mxu1 }
 0x28b   :  { %v828_v41 = vmul.f32 %v2165_v58, %v2569_v47 }
 0x28c   :  { %v804_v59 = vpop.f32.mrf.mxu1 }
 0x28d   :  { %v827_v3 = vmul.f32 %v804_v59, %v2569_v47 }
 0x28e   :  { %v2168_v61 = vpop.f32.mrf.mxu1 }
 0x28f   :  { %v830_v63 = vmul.f32 %v2168_v61, %v2569_v47 }
 0x290   :  { %v814_v0 = vpop.f32.mrf.mxu1 }
 0x291   :  { %v829_v2 = vmul.f32 %v814_v0, %v2569_v47  ;;  %2170 = vmatpush3.msra.mxu1 %v830_v63  ;;  %v1004_v47 = vld [vmem:[%s2982_s8 + $0x18] sm:$0xff] }
 0x292   :  { %2171 = vmatprep.subr.mxu1 %v2422_v1 }
 0x293   :  { %2172 = vmatpush3.msra.mxu1 %v829_v2 }
 0x294   :  { %2173 = vmatprep.subr.mxu1 %v2422_v1 }
 0x295   :  { %2174 = vmatpush3.msra.mxu1 %v828_v41 }
 0x296   :  { %2175 = vmatprep.subr.mxu1 %v2422_v1 }
 0x297   :  { %2176 = vmatpush3.msra.mxu1 %v827_v3 }
 0x298   :  { %2177 = vmatprep.subr.mxu1 %v2422_v1 }
 0x299   :  { %2178 = vmatpush3.msra.mxu1 %v826_v4 }
 0x29a   :  { %2179 = vmatprep.subr.mxu1 %v2422_v1 }
 0x29b   :  { %2180 = vmatpush3.msra.mxu1 %v825_v6 }
 0x29c   :  { %2181 = vmatprep.subr.mxu1 %v2422_v1 }
 0x29d   :  { %2182 = vmatpush3.msra.mxu1 %v824_v7 }
 0x29e   :  { %2183 = vmatprep.subr.mxu1 %v2422_v1 }
 0x29f   :  { %2184 = vmatpush3.msra.mxu1 %v823_v9 }
 0x2a0   :  { %2186 = vmatmul.mubr.msk.f32.vlgmr.msra.gmra.mxu1 %vm831_vm6, %v2704_v10  ;;  %2188 = vmatprep.subr.mxu1 %v2422_v1 }
 0x2a1   :  { %2189 = vmatpush3.msk.msra.mxu1 %vm714_vm11, %v2603_v26  ;;  %2190 = vmatprep.mubr.msk.f32.mxu1 %vm2423_vm0, %v2422_v1  ;;  %v1003_v26 = vld [vmem:[%s2982_s8 + $0x10] sm:$0xff] }
 0x2a2   :  { %2193 = vmatprep.subr.mxu1 %v2422_v1 }
 0x2a4   :  { %2191 = vmatmul.mubr.msk.f32.vlgmr.msra.gmra.mxu1 %vm545_vm12, %v926_v51 }
 0x2a5   :  { %2201 = vmatprep.mubr.msk.f32.mxu1 %vm2423_vm0, %v2422_v1  ;;  %2194 = vmatpush3.msra.mxu1 %v1004_v47 }
 0x2a6   :  { %2195 = vmatprep.subr.mxu1 %v2422_v1 }
 0x2a7   :  { %2196 = vmatpush3.msra.mxu1 %v1003_v26 }
 0x2a8   :  { %2197 = vmatprep.subr.mxu1 %v2422_v1 }
 0x2a9   :  { %2198 = vmatpush3.msra.mxu1 %v1002_v11 }
 0x2aa   :  { %2199 = vmatprep.subr.mxu1 %v2422_v1 }
 0x2ab   :  { %2200 = vmatpush3.msra.mxu1 %v1001_v13 }
 0x2ac   :  { %2215 = vmatprep.subr.mxu1 %v1026_v14 }
 0x360   :  { %v901_v54 = vpop.f32.mrf.mxu1 }
 0x362   :  { %v2187_v16 = vpop.f32.mrf.mxu1 }
 0x364   :  { %v995_v17 = vpop.f32.mrf.mxu1 }
 0x365   :  { %v999_v19 = vmul.f32 %v995_v17, %v901_v54 }
 0x366   :  { %v2192_v62 = vpop.f32.mrf.mxu1 }
 0x367   :  { %v1000_v20 = vmax.f32 %v999_v19, 0.0 }
 0x369   :  { %2202 = vmatmul.mubr.msk.f32.vlgmr.msra.gmra.mxu1 %vm407_vm2, %v1000_v20  ;;  %2213 = vmatmul.mubr.msk.f32.vlgmr.msra.gmra.mxu0 %vm407_vm2, %v1000_v20 }
 0x36a   :  { %2216 = vmatpush3.msra.mxu1 %v1026_v14 }
 0x36b   :  { %2217 = vmatprep.subr.mxu1 %v1025_v21 }
 0x36c   :  { %2218 = vmatpush3.msra.mxu1 %v1025_v21 }
 0x36d   :  { %2219 = vmatprep.subr.mxu1 %v1024_v8 }
 0x36e   :  { %2220 = vmatpush3.msra.mxu1 %v1024_v8 }
 0x36f   :  { %2221 = vmatprep.subr.mxu1 %v1023_v18 }
 0x370   :  { %2222 = vmatpush3.msra.mxu1 %v1023_v18 }
 0x371   :  { %2223 = vmatprep.subr.mxu1 %v1022_v22 }
 0x372   :  { %2224 = vmatpush3.msra.mxu1 %v1022_v22 }
 0x373   :  { %2225 = vmatprep.subr.mxu1 %v1021_v23 }
 0x374   :  { %2226 = vmatpush3.msra.mxu1 %v1021_v23 }
 0x375   :  { %2227 = vmatprep.subr.mxu1 %v1020_v24 }
 0x376   :  { %2228 = vmatpush3.msra.mxu1 %v1020_v24 }
 0x377   :  { %2229 = vmatprep.subr.mxu1 %v1019_v25 }
 0x378   :  { %2230 = vmatpush3.msra.mxu1 %v1019_v25 }
 0x379   :  { %2231 = vmatprep.subr.mxu1 %v1018_v31 }
 0x37a   :  { %2232 = vmatpush3.msra.mxu1 %v1018_v31 }
 0x37b   :  { %2233 = vmatprep.subr.mxu1 %v1017_v33 }
 0x37c   :  { %2234 = vmatpush3.msra.mxu1 %v1017_v33 }
 0x37d   :  { %2235 = vmatprep.subr.mxu1 %v1016_v34 }
 0x37e   :  { %2236 = vmatpush3.msra.mxu1 %v1016_v34 }
 0x37f   :  { %2237 = vmatprep.subr.mxu1 %v1015_v37 }
 0x380   :  { %2238 = vmatpush3.msra.mxu1 %v1015_v37 }
 0x381   :  { %2239 = vmatprep.subr.mxu1 %v1014_v38 }
 0x382   :  { %2240 = vmatpush3.msra.mxu1 %v1014_v38 }
 0x383   :  { %2241 = vmatprep.subr.mxu1 %v1013_v40 }
 0x384   :  { %2242 = vmatpush3.msra.mxu1 %v1013_v40 }
 0x385   :  { %2243 = vmatprep.subr.mxu1 %v1012_v42 }
 0x386   :  { %2244 = vmatpush3.msra.mxu1 %v1012_v42 }
 0x387   :  { %2245 = vmatprep.subr.mxu1 %v1011_v43 }
 0x388   :  { %2246 = vmatpush3.msra.mxu1 %v1011_v43 }
 0x429   :  { %v1103_v46 = vpop.f32.mrf.mxu1  ;;  %v1179_v32 = vpop.f32.mrf.mxu0 }
 0x42a   :  { %v1180_v49 = vadd.f32 %v1997_v44, %v1179_v32  ;;  %v2801_v0 = vadd.f32 %v1995_v55, %v1103_v46 }
 0x42b   :  { %v2203_v50 = vpop.f32.mrf.mxu1  ;;  %v2214_v51 = vpop.f32.mrf.mxu0 }
 0x42c   :  { %v1184_v52 = vcombine.high %v1180_v49, %v1180_v49  ;;  %v1191_v53 = vrot.slane %v1180_v49, %v2561_v35 }
 0x42e   :  { %v1198_v56 = vrot.slane %v1184_v52, %v2561_v35  ;;  %v1199_v36 = vcombine.high %v1191_v53, %v1191_v53  ;;  %v1207_v57 = vrot.slane %v1191_v53, %v2561_v35 }
 0x430   :  { %v1200_v58 = vcombine.high %v1198_v56, %v1198_v56  ;;  %v1214_v59 = vrot.slane %v1198_v56, %v2561_v35  ;;  %v1221_v61 = vrot.slane %v1199_v36, %v2561_v35  ;;  %v1229_v63 = vcombine.high %v1207_v57, %v1207_v57 }
 0x431   :  { %v1236_v2 = vrot.slane %v1207_v57, %v2555_v15 }
 0x432   :  { %v1228_v41 = vrot.slane %v1200_v58, %v2561_v35  ;;  %v1230_v3 = vcombine.high %v1214_v59, %v1214_v59  ;;  %v1231_v4 = vcombine.high %v1221_v61, %v1221_v61  ;;  %v1240_v6 = vrot.slane %v1221_v61, %v2555_v15 }
 0x433   :  { %v1273_v7 = vadd.f32 %v1236_v2, %v2801_v0  ;;  %v1244_v9 = vrot.slane %v1229_v63, %v2555_v15  ;;  %v1252_v47 = vrot.slane %v1214_v59, %v2555_v15 }
 0x434   :  { %v1274_v48 = vadd.f32 %v1240_v6, %v2801_v0  ;;  %v1248_v26 = vrot.slane %v1231_v4, %v2555_v15  ;;  %v1256_v11 = vrot.slane %v1228_v41, %v2555_v15  ;;  %v1260_v12 = vrot.slane %v1230_v3, %v2555_v15 }
 0x435   :  { %vm1281_vm2 = vcmp.ge.f32.partialorder %v1273_v7, 0.0  ;;  %v1289_v35 = vmul.f32 0.2, %v1273_v7  ;;  %v1275_v13 = vadd.f32 %v1244_v9, %v2801_v0  ;;  %v1277_v14 = vadd.f32 %v1252_v47, %v2801_v0 }
 0x436   :  { %vm1282_vm7 = vcmp.ge.f32.partialorder %v1274_v48, 0.0  ;;  %v1290_v54 = vmul.f32 0.2, %v1274_v48  ;;  %v1276_v16 = vadd.f32 %v1248_v26, %v2801_v0  ;;  %v1278_v21 = vadd.f32 %v1256_v11, %v2801_v0 }
 0x437   :  { %v1297_v17 = vsel %vm1281_vm2, %v1273_v7, %v1289_v35  ;;  %vm1283_vm8 = vcmp.ge.f32.partialorder %v1275_v13, 0.0  ;;  %v1291_v19 = vmul.f32 0.2, %v1275_v13  ;;  %v1293_v18 = vmul.f32 0.2, %v1277_v14 }
 0x438   :  { %2247 = vmatprep.mubr.f32.mxu1 %v1297_v17  ;;  %v1298_v62 = vsel %vm1282_vm7, %v1274_v48, %v1290_v54  ;;  %v1292_v20 = vmul.f32 0.2, %v1276_v16  ;;  %vm1284_vm9 = vcmp.ge.f32.partialorder %v1276_v16, 0.0  ;;  %v1279_v22 = vadd.f32 %v1260_v12, %v2801_v0 }
 0x439   :  { %2248 = vmatmul.mubr.f32.vlgmr.msra.gmra.mxu1 %v1298_v62  ;;  %v1299_v8 = vsel %vm1283_vm8, %v1275_v13, %v1291_v19  ;;  %vm1285_vm10 = vcmp.ge.f32.partialorder %v1277_v14, 0.0  ;;  %v1232_v23 = vcombine.high %v1228_v41, %v1228_v41  ;;  %v1294_v25 = vmul.f32 0.2, %v1278_v21 }
 0x43a   :  { %2250 = vmatprep.mubr.f32.mxu1 %v1299_v8  ;;  %v1300_v24 = vsel %vm1284_vm9, %v1276_v16, %v1292_v20  ;;  %v1301_v33 = vsel %vm1285_vm10, %v1277_v14, %v1293_v18  ;;  %vm1286_vm2 = vcmp.ge.f32.partialorder %v1278_v21, 0.0  ;;  %v1295_v34 = vmul.f32 0.2, %v1279_v22 }
 0x43b   :  { %v1264_v31 = vrot.slane %v1232_v23, %v2555_v15  ;;  %vm1287_vm7 = vcmp.ge.f32.partialorder %v1279_v22, 0.0  ;;  %v1302_v38 = vsel %vm1286_vm2, %v1278_v21, %v1294_v25  ;;  %v2823_v15 = vld [vmem:[%s2987_s13] sm:$0xf] }
 0x43c   :  { %v1303_v42 = vsel %vm1287_vm7, %v1279_v22, %v1295_v34  ;;  %2259 = vmatprep.subr.msk.mxu0 %vm714_vm11, %v2823_v15 }
 0x43d   :  { %2251 = vmatmul.mubr.f32.gmra.mxu1 %v1300_v24  ;;  %v1280_v37 = vadd.f32 %v1264_v31, %v2801_v0  ;;  %2260 = vmatpush3.msk.msra.mxu0 %vm714_vm11, %v2823_v15 }
 0x43e   :  { %2253 = vmatprep.mubr.f32.mxu1 %v1301_v33  ;;  %2273 = vmatprep.subr.mxu0 %v2422_v1 }
 0x43f   :  { %v1296_v40 = vmul.f32 0.2, %v1280_v37  ;;  %vm1288_vm8 = vcmp.ge.f32.partialorder %v1280_v37, 0.0 }
 0x441   :  { %2254 = vmatmul.mubr.f32.gmra.mxu1 %v1302_v38  ;;  %v1304_v43 = vsel %vm1288_vm8, %v1280_v37, %v1296_v40 }
 0x442   :  { %2256 = vmatprep.mubr.f32.mxu1 %v1303_v42 }
 0x445   :  { %2257 = vmatmul.mubr.f32.gmra.mxu1 %v1304_v43 }
 0x4f9   :  { %v2249_v44 = vpop.f32.mrf.mxu1 }
 0x4fa   :  { %v1411_v46 = vadd.f32 %v2249_v44, %v2614_v29 }
 0x4fb   :  { %v1371_v32 = vpop.f32.mrf.mxu1 }
 0x4fc   :  { %v1425_v49 = vsel %vm545_vm12, %v1411_v46, -inf  ;;  %v1410_v50 = vadd.f32 %v1371_v32, %v2610_v27 }
 0x4fd   :  { %v1426_v51 = vrot.slane %v1425_v49, 4  ;;  %v2252_v52 = vpop.f32.mrf.mxu1 }
 0x4fe   :  { %v1418_v53 = vsel %vm545_vm12, %v1410_v50, -inf  ;;  %v1413_v55 = vadd.f32 %v2252_v52, %v2616_v30 }
 0x4ff   :  { %v1427_v56 = vmax.f32 %v1425_v49, %v1426_v51  ;;  %v1419_v36 = vrot.slane %v1418_v53, 4  ;;  %v1381_v57 = vpop.f32.mrf.mxu1 }
 0x500   :  { %v1439_v58 = vsel %vm545_vm12, %v1413_v55, -inf  ;;  %v2837_v59 = vadd.f32 %v1381_v57, %v2612_v28 }
 0x501   :  { %v1428_v29 = vrot.slane %v1427_v56, 2  ;;  %v1420_v61 = vmax.f32 %v1418_v53, %v1419_v36  ;;  %v1440_v63 = vrot.slane %v1439_v58, 4  ;;  %v2255_v2 = vpop.f32.mrf.mxu1 }
 0x502   :  { %v1432_v27 = vsel %vm545_vm12, %v2837_v59, -inf  ;;  %v2842_v41 = vadd.f32 %v2255_v2, %v2621_v39 }
 0x503   :  { %v1429_v3 = vmax.f32 %v1427_v56, %v1428_v29  ;;  %v1421_v30 = vrot.slane %v1420_v61, 2  ;;  %v1441_v4 = vmax.f32 %v1439_v58, %v1440_v63  ;;  %v1433_v6 = vrot.slane %v1432_v27, 4  ;;  %v1391_v7 = vpop.f32.mrf.mxu1 }
 0x504   :  { %v1453_v9 = vsel %vm545_vm12, %v2842_v41, -inf  ;;  %v1414_v28 = vadd.f32 %v1391_v7, %v2627_v45 }
 0x505   :  { %v1430_v47 = vrot.slane %v1429_v3, 1  ;;  %v1422_v48 = vmax.f32 %v1420_v61, %v1421_v30  ;;  %v1442_v26 = vrot.slane %v1441_v4, 2  ;;  %v1434_v11 = vmax.f32 %v1432_v27, %v1433_v6  ;;  %v2258_v12 = vpop.f32.mrf.mxu1 }
 0x506   :  { %v1454_v35 = vrot.slane %v1453_v9, 4  ;;  %v1446_v13 = vsel %vm545_vm12, %v1414_v28, -inf  ;;  %v1417_v39 = vadd.f32 %v2258_v12, %v2639_v60 }
 0x507   :  { %v1431_v14 = vmax.f32 %v1429_v3, %v1430_v47  ;;  %v1423_v54 = vrot.slane %v1422_v48, 1  ;;  %v1443_v16 = vmax.f32 %v1441_v4, %v1442_v26  ;;  %v1435_v17 = vrot.slane %v1434_v11, 2  ;;  %v1401_v19 = vpop.f32.mrf.mxu1 }
 0x508   :  { %v1455_v62 = vmax.f32 %v1453_v9, %v1454_v35  ;;  %v1447_v20 = vrot.slane %v1446_v13, 4  ;;  %v1467_v21 = vsel %vm545_vm12, %v1417_v39, -inf  ;;  %v1416_v45 = vadd.f32 %v1401_v19, %v2644_v5 }
 0x509   :  { %v1475_v8 = vsub.f32 %v1411_v46, %v1431_v14  ;;  %v1424_v18 = vmax.f32 %v1422_v48, %v1423_v54  ;;  %v1444_v22 = vrot.slane %v1443_v16, 1  ;;  %v1436_v23 = vmax.f32 %v1434_v11, %v1435_v17 }
 0x50a   :  { %v1456_v24 = vrot.slane %v1455_v62, 2  ;;  %v1448_v25 = vmax.f32 %v1446_v13, %v1447_v20  ;;  %v1468_v31 = vrot.slane %v1467_v21, 4  ;;  %v1460_v60 = vsel %vm545_vm12, %v1416_v45, -inf }
 0x50b   :  { %v1484_v33 = vmul.f32 1.442695, %v1475_v8  ;;  %v1474_v34 = vsub.f32 %v1410_v50, %v1424_v18  ;;  %v1445_v37 = vmax.f32 %v1443_v16, %v1444_v22  ;;  %v1437_v38 = vrot.slane %v1436_v23, 1 }
 0x50c   :  { %v1457_v40 = vmax.f32 %v1455_v62, %v1456_v24  ;;  %v1449_v42 = vrot.slane %v1448_v25, 2  ;;  %v1469_v43 = vmax.f32 %v1467_v21, %v1468_v31  ;;  %v1461_v44 = vrot.slane %v1460_v60, 4 }
 0x50d   :  { %2368 = vpow2.f32 %v1484_v33  ;;  %v1482_v32 = vmul.f32 1.442695, %v1474_v34  ;;  %v1477_v5 = vsub.f32 %v1413_v55, %v1445_v37  ;;  %v1438_v46 = vmax.f32 %v1436_v23, %v1437_v38 }
 0x50e   :  { %v1458_v49 = vrot.slane %v1457_v40, 1  ;;  %v1450_v51 = vmax.f32 %v1448_v25, %v1449_v42  ;;  %v1470_v52 = vrot.slane %v1469_v43, 2  ;;  %v1462_v53 = vmax.f32 %v1460_v60, %v1461_v44 }
 0x50f   :  { %2370 = vpow2.f32 %v1482_v32  ;;  %v1488_v56 = vmul.f32 1.442695, %v1477_v5  ;;  %v1476_v36 = vsub.f32 %v2837_v59, %v1438_v46 }
 0x510   :  { %v1459_v57 = vmax.f32 %v1457_v40, %v1458_v49  ;;  %v1451_v50 = vrot.slane %v1450_v51, 1  ;;  %v1471_v58 = vmax.f32 %v1469_v43, %v1470_v52  ;;  %v1463_v29 = vrot.slane %v1462_v53, 2 }
 0x511   :  { %2372 = vpow2.f32 %v1488_v56  ;;  %v1486_v61 = vmul.f32 1.442695, %v1476_v36 }
 0x512   :  { %v1479_v63 = vsub.f32 %v2842_v41, %v1459_v57  ;;  %v1452_v2 = vmax.f32 %v1450_v51, %v1451_v50  ;;  %v1472_v27 = vrot.slane %v1471_v58, 1  ;;  %v1464_v55 = vmax.f32 %v1462_v53, %v1463_v29 }
 0x513   :  { %2374 = vpow2.f32 %v1486_v61 }
 0x514   :  { %v1492_v3 = vmul.f32 1.442695, %v1479_v63  ;;  %v1478_v30 = vsub.f32 %v1414_v28, %v1452_v2  ;;  %v1473_v4 = vmax.f32 %v1471_v58, %v1472_v27  ;;  %v1465_v6 = vrot.slane %v1464_v55, 1 }
 0x516   :  { %2376 = vpow2.f32 %v1492_v3  ;;  %v1490_v7 = vmul.f32 1.442695, %v1478_v30  ;;  %v1481_v9 = vsub.f32 %v1417_v39, %v1473_v4  ;;  %v1466_v59 = vmax.f32 %v1464_v55, %v1465_v6 }
 0x518   :  { %2378 = vpow2.f32 %v1490_v7  ;;  %v1496_v47 = vmul.f32 1.442695, %v1481_v9  ;;  %v1480_v48 = vsub.f32 %v1416_v45, %v1466_v59 }
 0x51a   :  { %v2369_v26 = vpop.eup %2368  ;;  %2380 = vpow2.f32 %v1496_v47  ;;  %v1494_v11 = vmul.f32 1.442695, %v1480_v48 }
 0x51b   :  { %v1505_v41 = vsel %vm545_vm12, %v2369_v26, 0.0 }
 0x51c   :  { %v2371_v12 = vpop.eup %2370  ;;  %v1506_v35 = vrot.slane %v1505_v41, 4  ;;  %2382 = vpow2.f32 %v1494_v11 }
 0x51d   :  { %v1498_v13 = vsel %vm545_vm12, %v2371_v12, 0.0  ;;  %2261 = vmatprep.mubr.msk.f32.mxu0 %vm545_vm12, %v2371_v12 }
 0x51e   :  { %v2373_v28 = vpop.eup %2372  ;;  %v1507_v14 = vadd.f32 %v1506_v35, %v1505_v41  ;;  %v1499_v54 = vrot.slane %v1498_v13, 4  ;;  %2262 = vmatmul.mubr.msk.f32.vlgmr.msra.gmra.mxu0 %vm545_vm12, %v2369_v26 }
 0x51f   :  { %v1519_v39 = vsel %vm545_vm12, %v2373_v28, 0.0 }
 0x520   :  { %v2375_v16 = vpop.eup %2374  ;;  %v1508_v17 = vrot.slane %v1507_v14, 2  ;;  %v1500_v19 = vadd.f32 %v1499_v54, %v1498_v13  ;;  %v1520_v62 = vrot.slane %v1519_v39, 4 }
 0x521   :  { %v1512_v20 = vsel %vm545_vm12, %v2375_v16, 0.0  ;;  %2264 = vmatprep.mubr.msk.f32.mxu0 %vm545_vm12, %v2375_v16 }
 0x522   :  { %v1509_v21 = vadd.f32 %v1508_v17, %v1507_v14  ;;  %v1501_v45 = vrot.slane %v1500_v19, 2  ;;  %v1521_v8 = vadd.f32 %v1520_v62, %v1519_v39  ;;  %v1513_v18 = vrot.slane %v1512_v20, 4  ;;  %2265 = vmatmul.mubr.msk.f32.gmra.mxu0 %vm545_vm12, %v2373_v28 }
 0x523   :  { %v2377_v22 = vpop.eup %2376 }
 0x524   :  { %v1510_v23 = vrot.slane %v1509_v21, 1  ;;  %v1502_v24 = vadd.f32 %v1501_v45, %v1500_v19  ;;  %v1522_v25 = vrot.slane %v1521_v8, 2  ;;  %v1514_v31 = vadd.f32 %v1513_v18, %v1512_v20 }
 0x525   :  { %v2379_v60 = vpop.eup %2378  ;;  %v1533_v33 = vsel %vm545_vm12, %v2377_v22, 0.0 }
 0x526   :  { %v1511_v34 = vadd.f32 %v1510_v23, %v1509_v21  ;;  %v1503_v37 = vrot.slane %v1502_v24, 1  ;;  %v1523_v38 = vadd.f32 %v1522_v25, %v1521_v8  ;;  %v1515_v40 = vrot.slane %v1514_v31, 2  ;;  %2267 = vmatprep.mubr.msk.f32.mxu0 %vm545_vm12, %v2379_v60 }
 0x527   :  { %v2381_v42 = vpop.eup %2380  ;;  %v1534_v43 = vrot.slane %v1533_v33, 4  ;;  %v1526_v44 = vsel %vm545_vm12, %v2379_v60, 0.0  ;;  %2268 = vmatmul.mubr.msk.f32.gmra.mxu0 %vm545_vm12, %v2377_v22 }
 0x528   :  { %v1504_v32 = vadd.f32 %v1503_v37, %v1502_v24  ;;  %v1524_v5 = vrot.slane %v1523_v38, 1  ;;  %v1516_v46 = vadd.f32 %v1515_v40, %v1514_v31  ;;  %2384 = vrcp.f32 %v1511_v34 }
 0x529   :  { %v2383_v49 = vpop.eup %2382  ;;  %v1535_v51 = vadd.f32 %v1534_v43, %v1533_v33  ;;  %v1527_v52 = vrot.slane %v1526_v44, 4  ;;  %v1547_v53 = vsel %vm545_vm12, %v2381_v42, 0.0 }
 0x52a   :  { %2386 = vrcp.f32 %v1504_v32  ;;  %v1517_v56 = vrot.slane %v1516_v46, 1  ;;  %v1548_v36 = vrot.slane %v1547_v53, 4  ;;  %2270 = vmatprep.mubr.msk.f32.mxu0 %vm545_vm12, %v2383_v49  ;;  %v1525_v57 = vadd.f32 %v1524_v5, %v1523_v38 }
 0x52b   :  { %v1536_v50 = vrot.slane %v1535_v51, 2  ;;  %v1528_v58 = vadd.f32 %v1527_v52, %v1526_v44  ;;  %v1540_v29 = vsel %vm545_vm12, %v2383_v49, 0.0  ;;  %2271 = vmatmul.mubr.msk.f32.gmra.mxu0 %vm545_vm12, %v2381_v42  ;;  %v1873_v49 = vld [vmem:[%s2989_s15 + $0x60] sm:$0xff]  ;;  %v1871_v52 = vld [vmem:[%s2989_s15 + $0x50] sm:$0xff] }
 0x52c   :  { %v1518_v61 = vadd.f32 %v1517_v56, %v1516_v46  ;;  %v1549_v63 = vadd.f32 %v1548_v36, %v1547_v53  ;;  %v1541_v2 = vrot.slane %v1540_v29, 4  ;;  %2289 = vmatprep.mubr.msk.f32.mxu0 %vm2423_vm0, %v2422_v1  ;;  %v1870_v53 = vld [vmem:[%s2989_s15 + $0x48] sm:$0xff]  ;;  %v1869_v56 = vld [vmem:[%s2989_s15 + $0x40] sm:$0xff]  ;;  %v1868_v36 = vld [vmem:[%s2989_s15 + $0x38] sm:$0xff] }
 0x52d   :  { %v1537_v27 = vadd.f32 %v1536_v50, %v1535_v51  ;;  %v1529_v55 = vrot.slane %v1528_v58, 2  ;;  %v1872_v51 = vld [vmem:[%s2989_s15 + $0x58] sm:$0xff]  ;;  %v1866_v50 = vld [vmem:[%s2989_s15 + $0x28] sm:$0xff] }
 0x52e   :  { %2388 = vrcp.f32 %v1518_v61  ;;  %v1550_v3 = vrot.slane %v1549_v63, 2  ;;  %v1542_v30 = vadd.f32 %v1541_v2, %v1540_v29  ;;  %v1864_v29 = vld [vmem:[%s2989_s15 + $0x18] sm:$0xff]  ;;  %v1863_v61 = vld [vmem:[%s2989_s15 + $0x10] sm:$0xff]  ;;  %v1861_v2 = vld [vmem:[%s2989_s15] sm:$0xff] }
 0x52f   :  { %2390 = vrcp.f32 %v1525_v57  ;;  %v1538_v4 = vrot.slane %v1537_v27, 1  ;;  %v1530_v6 = vadd.f32 %v1529_v55, %v1528_v58  ;;  %v1867_v57 = vld [vmem:[%s2989_s15 + $0x30] sm:$0xff]  ;;  %v1865_v58 = vld [vmem:[%s2989_s15 + $0x20] sm:$0xff] }
 0x530   :  { %v1551_v7 = vadd.f32 %v1550_v3, %v1549_v63  ;;  %v1543_v9 = vrot.slane %v1542_v30, 2  ;;  %v1862_v63 = vld [vmem:[%s2989_s15 + $0x8] sm:$0xff] }
 0x531   :  { %v1531_v59 = vrot.slane %v1530_v6, 1  ;;  %v1539_v47 = vadd.f32 %v1538_v4, %v1537_v27 }
 0x532   :  { %v1552_v48 = vrot.slane %v1551_v7, 1  ;;  %v1544_v26 = vadd.f32 %v1543_v9, %v1542_v30 }
 0x533   :  { %v1532_v11 = vadd.f32 %v1531_v59, %v1530_v6 }
 0x534   :  { %v1545_v41 = vrot.slane %v1544_v26, 1  ;;  %v1553_v12 = vadd.f32 %v1552_v48, %v1551_v7  ;;  %v2011_v7 = vld [vmem:[%s2990_s16] ss:$0 sm:$0xff] }
 0x535   :  { %2392 = vrcp.f32 %v1532_v11  ;;  %v2385_v35 = vpop.eup %2384 }
 0x536   :  { %2394 = vrcp.f32 %v1539_v47  ;;  %v1546_v13 = vadd.f32 %v1545_v41, %v1544_v26 }
 0x537   :  { %v2387_v28 = vpop.eup %2386 }
 0x538   :  { %2396 = vrcp.f32 %v1546_v13  ;;  %v1780_v14 = vsel %vm913_vm13, %v2385_v35, %v2387_v28 }
 0x539   :  { %2398 = vrcp.f32 %v1553_v12 }
 0x53b   :  { %v2389_v54 = vpop.eup %2388 }
 0x53c   :  { %v2391_v39 = vpop.eup %2390  ;;  %v1781_v16 = vsel %vm915_vm14, %v2389_v54, %v1780_v14 }
 0x53d   :  { %v1782_v17 = vsel %vm917_vm15, %v2391_v39, %v1781_v16 }
 0x542   :  { %v2393_v19 = vpop.eup %2392 }
 0x543   :  { %v2395_v62 = vpop.eup %2394  ;;  %v1783_v20 = vsel %vm919_vm1, %v2393_v19, %v1782_v17 }
 0x544   :  { %v1784_v21 = vsel %vm921_vm3, %v2395_v62, %v1783_v20 }
 0x545   :  { %v2397_v45 = vpop.eup %2396 }
 0x546   :  { %v2399_v8 = vpop.eup %2398  ;;  %v1785_v18 = vsel %vm923_vm4, %v2397_v45, %v1784_v21 }
 0x547   :  { %v1786_v22 = vsel %vm925_vm5, %v2399_v8, %v1785_v18 }
 0x5de   :  { %v2263_v23 = vpop.f32.mrf.mxu0 }
 0x5df   :  { %v1695_v5 = vmul.f32 %v2263_v23, %v2801_v0 }
 0x5e0   :  { %v1655_v24 = vpop.f32.mrf.mxu0 }
 0x5e1   :  { %v1694_v46 = vmul.f32 %v1655_v24, %v2801_v0 }
 0x5e2   :  { %v2266_v25 = vpop.f32.mrf.mxu0 }
 0x5e3   :  { %v1697_v44 = vmul.f32 %v2266_v25, %v2801_v0 }
 0x5e4   :  { %v1665_v31 = vpop.f32.mrf.mxu0 }
 0x5e5   :  { %v1696_v32 = vmul.f32 %v1665_v31, %v2801_v0 }
 0x5e7   :  { %v2269_v60 = vpop.f32.mrf.mxu0 }
 0x5e8   :  { %v1699_v42 = vmul.f32 %v2269_v60, %v2801_v0 }
 0x5e9   :  { %v1675_v33 = vpop.f32.mrf.mxu0 }
 0x5ea   :  { %v1698_v43 = vmul.f32 %v1675_v33, %v2801_v0 }
 0x5eb   :  { %v2272_v34 = vpop.f32.mrf.mxu0 }
 0x5ec   :  { %v1701_v37 = vmul.f32 %v2272_v34, %v2801_v0 }
 0x5ed   :  { %v1685_v38 = vpop.f32.mrf.mxu0 }
 0x5ee   :  { %v1700_v40 = vmul.f32 %v1685_v38, %v2801_v0  ;;  %2274 = vmatpush3.msra.mxu0 %v1701_v37  ;;  %v1876_v0 = vld [vmem:[%s2989_s15 + $0x78] sm:$0xff] }
 0x5ef   :  { %2275 = vmatprep.subr.mxu0 %v2422_v1 }
 0x5f0   :  { %2276 = vmatpush3.msra.mxu0 %v1700_v40 }
 0x5f1   :  { %2277 = vmatprep.subr.mxu0 %v2422_v1 }
 0x5f2   :  { %2278 = vmatpush3.msra.mxu0 %v1699_v42 }
 0x5f3   :  { %2279 = vmatprep.subr.mxu0 %v2422_v1 }
 0x5f4   :  { %2280 = vmatpush3.msra.mxu0 %v1698_v43 }
 0x5f5   :  { %2281 = vmatprep.subr.mxu0 %v2422_v1 }
 0x5f6   :  { %2282 = vmatpush3.msra.mxu0 %v1697_v44 }
 0x5f7   :  { %2283 = vmatprep.subr.mxu0 %v2422_v1 }
 0x5f8   :  { %2284 = vmatpush3.msra.mxu0 %v1696_v32 }
 0x5f9   :  { %2285 = vmatprep.subr.mxu0 %v2422_v1 }
 0x5fa   :  { %2286 = vmatpush3.msra.mxu0 %v1695_v5 }
 0x5fb   :  { %2287 = vmatprep.subr.mxu0 %v2422_v1 }
 0x5fc   :  { %2288 = vmatpush3.msra.mxu0 %v1694_v46 }
 0x5fd   :  { %2290 = vmatmul.mubr.msk.f32.vlgmr.msra.gmra.mxu0 %vm831_vm6, %v2704_v10  ;;  %2292 = vmatprep.subr.mxu0 %v2422_v1  ;;  %v1875_v10 = vld [vmem:[%s2989_s15 + $0x70] sm:$0xff] }
 0x5fe   :  { %2293 = vmatpush3.msk.msra.mxu0 %vm714_vm11, %v2823_v15  ;;  %2294 = vmatprep.mubr.msk.f32.mxu0 %vm2423_vm0, %v2422_v1  ;;  %v1874_v15 = vld [vmem:[%s2989_s15 + $0x68] sm:$0xff]  ;;  %s2400_s15 = scalar_lea.vmem %s1963_s24, 128 }
 0x5ff   :  { %2297 = vmatprep.subr.mxu0 %v2422_v1  ;;  %p2401_p0 = scmp.ne.s32.totalorder %s1963_s24, %s2400_s15  ;;  %p2406_p2 = scmp.lt.s32.totalorder %s2400_s15, %s2400_s15 }
 0x601   :  { %2295 = vmatmul.mubr.msk.f32.vlgmr.msra.gmra.mxu0 %vm545_vm12, %v1786_v22  ;;  %p2407_p3 = por %p2406_p2, %p2405_p1 }
 0x602   :  { %2298 = vmatpush3.msra.mxu0 %v1876_v0  ;;  %2329 = vmatprep.mubr.msk.f32.mxu0 %vm2423_vm0, %v2422_v1  ;;  %vm1954_vm0 = vcmask 64512  }
 0x603   :  { %2299 = vmatprep.subr.mxu0 %v2422_v1  ;;  %p2408_p4 = pnand %p2407_p3, %p2401_p0 }
 0x604   :  { %2300 = vmatpush3.msra.mxu0 %v1875_v10 }
 0x605   :  { %2301 = vmatprep.subr.mxu0 %v2422_v1 }
 0x606   :  { %2302 = vmatpush3.msra.mxu0 %v1874_v15 }
 0x607   :  { %2303 = vmatprep.subr.mxu0 %v2422_v1 }
 0x608   :  { %2304 = vmatpush3.msra.mxu0 %v1873_v49 }
 0x609   :  { %2305 = vmatprep.subr.mxu0 %v2422_v1 }
 0x60a   :  { %2306 = vmatpush3.msra.mxu0 %v1872_v51 }
 0x60b   :  { %2307 = vmatprep.subr.mxu0 %v2422_v1 }
 0x60c   :  { %2308 = vmatpush3.msra.mxu0 %v1871_v52 }
 0x60d   :  { %2309 = vmatprep.subr.mxu0 %v2422_v1 }
 0x60e   :  { %2310 = vmatpush3.msra.mxu0 %v1870_v53 }
 0x60f   :  { %2311 = vmatprep.subr.mxu0 %v2422_v1 }
 0x610   :  { %2312 = vmatpush3.msra.mxu0 %v1869_v56 }
 0x611   :  { %2313 = vmatprep.subr.mxu0 %v2422_v1 }
 0x612   :  { %2314 = vmatpush3.msra.mxu0 %v1868_v36 }
 0x613   :  { %2315 = vmatprep.subr.mxu0 %v2422_v1 }
 0x614   :  { %2316 = vmatpush3.msra.mxu0 %v1867_v57 }
 0x615   :  { %2317 = vmatprep.subr.mxu0 %v2422_v1 }
 0x616   :  { %2318 = vmatpush3.msra.mxu0 %v1866_v50 }
 0x617   :  { %2319 = vmatprep.subr.mxu0 %v2422_v1 }
 0x618   :  { %2320 = vmatpush3.msra.mxu0 %v1865_v58 }
 0x619   :  { %2321 = vmatprep.subr.mxu0 %v2422_v1 }
 0x61a   :  { %2322 = vmatpush3.msra.mxu0 %v1864_v29 }
 0x61b   :  { %2323 = vmatprep.subr.mxu0 %v2422_v1 }
 0x61c   :  { %2324 = vmatpush3.msra.mxu0 %v1863_v61 }
 0x61d   :  { %2325 = vmatprep.subr.mxu0 %v2422_v1 }
 0x61e   :  { %2326 = vmatpush3.msra.mxu0 %v1862_v63 }
 0x61f   :  { %2327 = vmatprep.subr.mxu0 %v2422_v1 }
 0x620   :  { %2328 = vmatpush3.msra.mxu0 %v1861_v2 }
 0x6bd   :  { %v1768_v27 = vpop.f32.mrf.mxu0 }
 0x6bf   :  { %v2291_v55 = vpop.f32.mrf.mxu0 }
 0x6c1   :  { %v1855_v3 = vpop.f32.mrf.mxu0 }
 0x6c2   :  { %v1859_v30 = vmul.f32 %v1855_v3, %v1768_v27 }
 0x6c3   :  { %v2296_v4 = vpop.f32.mrf.mxu0 }
 0x6c4   :  { %v1860_v6 = vmax.f32 %v1859_v30, 0.0 }
 0x6c6   :  { %2330 = vmatmul.mubr.f32.vlgmr.msra.gmra.mxu0 %v1860_v6 }
 0x786   :  { %v1950_v9 = vpop.f32.mrf.mxu0 }
 0x787   :  { %v1951_v59 = vadd.f32 %v2011_v7, %v1950_v9 }
 0x788   :  { %v2331_v47 = vpop.f32.mrf.mxu0 }
 0x789   :  { %1955 = vst.msk [vmem:[#allocation2] sm:$0xff] %vm1954_vm0, %v1951_v59 }
 0x78a   :  { %2411 = shalt.err (!%p2408_p4)
}
 0x78b   :  { %1965 = dma.vmem_to_hbm [thread:$0]  %s1963_s24, 128, %s2991_s17, [#allocation3]  }
 0x78c   :  { %2420 = dma.done.wait [#allocation3], 128  }
 0x78d   :  { %2421 = vsyncadd [#allocation3], 4294967168 }
 0x78e   :  { %1969 = vsyncpa [#allocation3], 1 }

</bundles_post_ra>
